<compile_context>
chip_gen: v7x
topology: tpu7x:2x2x1
jax: 0.10.0
libtpu: 0.0.40
codegen_flags: <defaults>
</compile_context>

<pallas_src>
import jax
import jax.numpy as jnp
from jax import lax
from jax.experimental import pallas as pl
from jax.experimental.pallas import tpu as pltpu


# --------------------------------------------------------------------------- #
# Helpers
# --------------------------------------------------------------------------- #
def _guard_lanes(W):
    # >= max |lane shift| of a 3x3 tap (W+1), rounded up to a 128-lane multiple
    # so the activation interior sits lane-aligned inside the extended buffer.
    return ((W + 1 + 127) // 128) * 128


def _vmem_budget_bytes():
    """~75% of this generation's VMEM (≈48 MiB on v7x, ≈96 MiB on v5e/v6e)."""
    try:
        cap = int(pltpu.get_tpu_info().vmem_capacity_bytes)
    except Exception:
        cap = 128 * 1024 * 1024
    return (cap * 3) // 4


def _vmem_step_bytes(P, Cin, Cout, E, out_itemsize):
    """Rough per-step VMEM footprint for a lane tile of width P."""
    Cmax = max(Cin, Cout)
    ext = Cmax * (P + 2 * E) * 4            # border-extended activation scratch
    x_in = 2 * Cin * P * 4                  # double-buffered input block
    out_b = 2 * Cout * P * out_itemsize     # double-buffered output block
    mask = 2 * 9 * P * 4                    # constant tap-mask block
    slop = 2 * 1024 * 1024                  # weights, table, internal scratch
    return ext + x_in + out_b + mask + slop


def _pick_batch_tile(N, H, W, Cin, Cout, E, out_itemsize, budget):
    """Batch tile B: fits the VMEM budget, keeps >=2 grid steps when possible
    (v7x megacore), and targets ~2-4K flattened pixels per step."""
    HW = H * W

    def lane_ok(b):  # multi-step blocks must be 128-lane aligned
        return (N // b == 1) or ((b * HW) % 128 == 0)

    divisors = [b for b in range(1, N + 1) if N % b == 0]
    feasible = [b for b in divisors
                if lane_ok(b)
                and _vmem_step_bytes(b * HW, Cin, Cout, E, out_itemsize) <= budget]
    if not feasible:
        # TODO(synk): huge H*W needs row-strip tiling of the lane axis.
        return 1 if lane_ok(1) else N

    target = 2048 if budget <= 64 * 1024 * 1024 else 4096
    multi = [b for b in feasible if N // b >= 2]   # keep both TCs busy on v7x
    cands = multi if multi else feasible
    reach = [b for b in cands if b * HW >= target]
    return min(reach) if reach else max(cands)


# --------------------------------------------------------------------------- #
# Kernel
# --------------------------------------------------------------------------- #
def _make_kernel(H, W, Cin, Cout, B, identity, cdtype):
    P = B * H * W
    E = _guard_lanes(W)
    Cmax = max(Cin, Cout)
    f32 = jnp.float32

    def kernel(x_ref, w1_ref, w2_ref, wsc_ref, p_ref, mask_ref, o_ref, ext_ref):
        # Zero the two guard strips each step (masks already zero every
        # out-of-image tap; this only keeps uninitialized / stale VMEM from
        # turning 0*NaN into NaN, and stays correct when the "parallel" grid
        # axis is sharded across TensorCores).
        guard = jnp.zeros((Cmax, E), f32)
        ext_ref[:, 0:E] = guard
        ext_ref[:, E + P:E + P + E] = guard

        # Packed per-channel table, hoisted once per step.
        s1 = p_ref[:Cin, 0:1]
        t1 = p_ref[:Cin, 1:2]
        s2 = p_ref[:Cout, 2:3]
        t2 = p_ref[:Cout, 3:4]
        b2 = p_ref[:Cout, 4:5]

        # ---- bn1 (running stats folded to scale/shift) + ReLU, lane-dense ----
        a1 = jnp.maximum(x_ref[...] * s1 + t1, 0.0)
        ext_ref[:Cin, E:E + P] = a1          # lane-aligned store (E % 128 == 0)

        # ---- 3x3 conv = 9 accumulated (Cout, C) @ (C, P) MXU matmuls ----
        def conv3x3(w_ref, C):
            acc = None
            for kh in range(3):
                for kw in range(3):
                    tap = kh * 3 + kw
                    d = (kh - 1) * W + (kw - 1)
                    win = ext_ref[:C, E + d:E + d + P]      # shifted window
                    if tap != 4:                            # centre tap: no mask
                        win = win * mask_ref[tap:tap + 1, :]
                    if cdtype != f32:                       # bf16 only at the MXU
                        win = win.astype(cdtype)
                    contrib = jnp.dot(w_ref[tap], win,
                                      preferred_element_type=f32)
                    acc = contrib if acc is None else acc + contrib
            return acc

        y = conv3x3(w1_ref, Cin)

        # ---- bn2 (conv1 bias folded into t2) + ReLU ----
        # TODO(synk): Dropout2d is identity in eval mode; training-mode channel
        # dropout / batch-statistic BN are not implemented.
        y = jnp.maximum(y * s2 + t2, 0.0)
        ext_ref[:Cout, E:E + P] = y

        # ---- conv2 + bias(es) + shortcut ----
        out = conv3x3(w2_ref, Cout) + b2
        x2 = x_ref[...]                       # re-read: short live range for x
        if identity:
            out = out + x2                    # nn.Identity: plain add, no matmul
        else:
            xs = x2 if cdtype == f32 else x2.astype(cdtype)
            out = out + jnp.dot(wsc_ref[...], xs, preferred_element_type=f32)
        o_ref[...] = out.astype(o_ref.dtype)  # lane-dense store

    return kernel, P, E


# --------------------------------------------------------------------------- #
# Flat (channels-first) entry point: x is (Cin, N*H*W), returns (Cout, N*H*W)
# --------------------------------------------------------------------------- #
def residual_block_forward_flat(x_flat, params, N, H, W, *,
                                compute_dtype=jnp.float32,
                                out_dtype=jnp.float32,
                                batch_tile=None):
    eps = 1e-5
    Cin = x_flat.shape[0]
    Cout = params["conv1_w"].shape[0]
    identity = (Cin == Cout)                      # stride == 1 on this path
    Cmax = max(Cin, Cout)
    x_flat = x_flat.astype(jnp.float32)

    # ---- fold BN running stats / conv biases into one packed (Cmax, 5) table ----
    s1 = params["bn1_gamma"] / jnp.sqrt(params["bn1_var"] + eps)
    t1 = params["bn1_beta"] - params["bn1_mean"] * s1
    s2 = params["bn2_gamma"] / jnp.sqrt(params["bn2_var"] + eps)
    t2 = params["conv1_b"] * s2 + (params["bn2_beta"] - params["bn2_mean"] * s2)
    bias = params["conv2_b"] + (0.0 if identity else params["sc_b"])
    pk = jnp.zeros((Cmax, 5), jnp.float32)
    pk = pk.at[:Cin, 0].set(s1).at[:Cin, 1].set(t1)
    pk = pk.at[:Cout, 2].set(s2).at[:Cout, 3].set(t2).at[:Cout, 4].set(bias)

    # ---- conv weights as per-tap matrices: (Cout, Cin, 3, 3) -> (9, Cout, Cin) ----
    w1 = jnp.transpose(params["conv1_w"], (2, 3, 0, 1)).reshape(9, Cout, Cin)
    w2 = jnp.transpose(params["conv2_w"], (2, 3, 0, 1)).reshape(9, Cout, Cout)
    w1 = w1.astype(compute_dtype)
    w2 = w2.astype(compute_dtype)
    if identity:
        wsc = jnp.zeros((Cout, Cin), compute_dtype)     # unused at trace time
    else:
        wsc = params["sc_w"].reshape(Cout, Cin).astype(compute_dtype)

    # ---- generation-aware tile selection ----
    E = _guard_lanes(W)
    budget = _vmem_budget_bytes()
    out_itemsize = jnp.dtype(out_dtype).itemsize
    B = batch_tile or _pick_batch_tile(N, H, W, Cin, Cout, E, out_itemsize, budget)
    kernel, P, E = _make_kernel(H, W, Cin, Cout, B, identity, compute_dtype)

    # ---- per-tap validity masks over the flattened (b, h, w) lane axis ----
    pp = jnp.arange(P)
    hh = (pp % (H * W)) // W
    ww = pp % W
    rows = []
    for kh in range(3):
        for kw in range(3):
            dh, dw = kh - 1, kw - 1
            rows.append((hh + dh >= 0) & (hh + dh < H)
                        & (ww + dw >= 0) & (ww + dw < W))
    mask = jnp.stack(rows).astype(jnp.float32)           # (9, P), f32 (v5e-safe)

    out_flat = pl.pallas_call(
        kernel,
        out_shape=jax.ShapeDtypeStruct((Cout, N * H * W), out_dtype),
        grid_spec=pltpu.PrefetchScalarGridSpec(
            num_scalar_prefetch=0,
            grid=(N // B,),
            in_specs=[
                pl.BlockSpec((Cin, P), lambda n: (0, n)),          # x (lane-dense)
                pl.BlockSpec((9, Cout, Cin), lambda n: (0, 0, 0)),  # conv1 taps
                pl.BlockSpec((9, Cout, Cout), lambda n: (0, 0, 0)), # conv2 taps
                pl.BlockSpec((Cout, Cin), lambda n: (0, 0)),        # 1x1 shortcut
                pl.BlockSpec((Cmax, 5), lambda n: (0, 0)),          # packed table
                pl.BlockSpec((9, P), lambda n: (0, 0)),             # tap masks
            ],
            out_specs=pl.BlockSpec((Cout, P), lambda n: (0, n)),    # lane-dense
            scratch_shapes=[
                pltpu.VMEM((Cmax, P + 2 * E), jnp.float32),         # extended act.
            ],
        ),
        compiler_params=pltpu.CompilerParams(
            dimension_semantics=("parallel",),      # batch tiles are independent
            vmem_limit_bytes=int(budget),
        ),
    )(x_flat, w1, w2, wsc, pk, mask)
    return out_flat


# --------------------------------------------------------------------------- #
# NCHW wrapper (same interface as the PyTorch module)
# --------------------------------------------------------------------------- #
def residual_block_forward(x_nchw, params, stride=1,
                           compute_dtype=jnp.float32, batch_tile=None):
    if stride != 1:
        # TODO(synk): stride>1 (strided window gather) is not implemented in the
        # Pallas kernel; fall back to the XLA path to keep module semantics.
        return reference_forward(x_nchw, params, stride=stride,
                                 compute_dtype=jnp.float32)

    N, Cin, H, W = x_nchw.shape
    Cout = params["conv1_w"].shape[0]
    # TODO(synk): in a multi-block stack keep activations in (C, N*H*W) layout
    # (call residual_block_forward_flat directly) so these two HBM relayouts
    # are paid once per network, not once per residual block.
    x_flat = jnp.transpose(x_nchw, (1, 0, 2, 3)).reshape(Cin, N * H * W)
    out_flat = residual_block_forward_flat(
        x_flat, params, N, H, W,
        compute_dtype=compute_dtype, out_dtype=jnp.float32,
        batch_tile=batch_tile)
    return jnp.transpose(out_flat.reshape(Cout, N, H, W), (1, 0, 2, 3))


# --------------------------------------------------------------------------- #
# Pure-JAX reference (for correctness checking / stride>1 fallback)
# --------------------------------------------------------------------------- #
def reference_forward(x_nchw, params, stride=1, compute_dtype=jnp.float32):
    eps = 1e-5
    x = jnp.transpose(x_nchw, (0, 2, 3, 1)).astype(jnp.float32)   # NCHW -> NHWC
    dn = ("NHWC", "HWIO", "NHWC")

    def bn(y, g, b, m, v):
        s = g / jnp.sqrt(v + eps)
        return y * s + (b - m * s)

    def conv(y, w, st, pad):
        return lax.conv_general_dilated(
            y.astype(compute_dtype), w.astype(compute_dtype),
            (st, st), ((pad, pad), (pad, pad)), dimension_numbers=dn,
            preferred_element_type=jnp.float32,
            precision=lax.Precision.HIGHEST)

    t = jnp.maximum(bn(x, params["bn1_gamma"], params["bn1_beta"],
                       params["bn1_mean"], params["bn1_var"]), 0.0)
    w1 = jnp.transpose(params["conv1_w"], (2, 3, 1, 0))
    y = conv(t, w1, stride, 1) + params["conv1_b"]
    y = jnp.maximum(bn(y, params["bn2_gamma"], params["bn2_beta"],
                       params["bn2_mean"], params["bn2_var"]), 0.0)
    w2 = jnp.transpose(params["conv2_w"], (2, 3, 1, 0))
    y = conv(y, w2, 1, 1) + params["conv2_b"]

    Cin = x.shape[-1]
    Cout = params["conv1_w"].shape[0]
    if stride != 1 or Cin != Cout:
        ws = jnp.transpose(params["sc_w"], (2, 3, 1, 0))
        sc = conv(x, ws, stride, 0) + params["sc_b"]
    else:
        sc = x
    return jnp.transpose(y + sc, (0, 3, 1, 2))


# --------------------------------------------------------------------------- #
# Main
# --------------------------------------------------------------------------- #
def _init_params(key, Cin, Cout):
    ks = jax.random.split(key, 16)
    f32 = jnp.float32
    return {
        "bn1_gamma": 1.0 + 0.1 * jax.random.normal(ks[0], (Cin,), f32),
        "bn1_beta":  0.1 * jax.random.normal(ks[1], (Cin,), f32),
        "bn1_mean":  0.1 * jax.random.normal(ks[2], (Cin,), f32),
        "bn1_var":   jax.random.uniform(ks[3], (Cin,), f32, 0.5, 1.5),
        "conv1_w":   0.1 * jax.random.normal(ks[4], (Cout, Cin, 3, 3), f32),
        "conv1_b":   0.1 * jax.random.normal(ks[5], (Cout,), f32),
        "bn2_gamma": 1.0 + 0.1 * jax.random.normal(ks[6], (Cout,), f32),
        "bn2_beta":  0.1 * jax.random.normal(ks[7], (Cout,), f32),
        "bn2_mean":  0.1 * jax.random.normal(ks[8], (Cout,), f32),
        "bn2_var":   jax.random.uniform(ks[9], (Cout,), f32, 0.5, 1.5),
        "conv2_w":   0.1 * jax.random.normal(ks[10], (Cout, Cout, 3, 3), f32),
        "conv2_b":   0.1 * jax.random.normal(ks[11], (Cout,), f32),
        "sc_w":      0.1 * jax.random.normal(ks[12], (Cout, Cin, 1, 1), f32),
        "sc_b":      0.1 * jax.random.normal(ks[13], (Cout,), f32),
    }


if __name__ == "__main__":
    key = jax.random.PRNGKey(0)
    k_x1, k_p1, k_x2, k_p2 = jax.random.split(key, 4)

    # Case 1: projection shortcut (Cin != Cout), bf16 MXU operands.
    N, Cin, Cout, H, W = 2, 4, 8, 16, 16
    x1 = jax.random.normal(k_x1, (N, Cin, H, W), jnp.float32)
    p1 = _init_params(k_p1, Cin, Cout)
    out1 = jax.block_until_ready(
        residual_block_forward(x1, p1, stride=1, compute_dtype=jnp.bfloat16))
    ref1 = jax.block_until_ready(
        reference_forward(x1, p1, stride=1, compute_dtype=jnp.bfloat16))
    assert out1.shape == ref1.shape, (out1.shape, ref1.shape)
    assert jnp.allclose(out1, ref1, rtol=2e-2, atol=2e-2), float(
        jnp.max(jnp.abs(out1 - ref1)))

    # Case 2: identity shortcut (Cin == Cout), f32 operands, tighter check.
    C2 = 8
    x2 = jax.random.normal(k_x2, (N, C2, H, W), jnp.float32)
    p2 = _init_params(k_p2, C2, C2)
    out2 = jax.block_until_ready(
        residual_block_forward(x2, p2, stride=1, compute_dtype=jnp.float32))
    ref2 = jax.block_until_ready(
        reference_forward(x2, p2, stride=1, compute_dtype=jnp.float32))
    assert out2.shape == ref2.shape, (out2.shape, ref2.shape)
    assert jnp.allclose(out2, ref2, rtol=5e-3, atol=5e-3), float(
        jnp.max(jnp.abs(out2 - ref2)))

    print("KERNEL_OK")
</pallas_src>

<mosaic_0001>
module attributes {stable_mosaic.version = 11 : i64} {
  func.func @kernel(%arg0: i32, %arg1: memref<4x256xf32, #tpu.memory_space<vmem>>, %arg2: memref<9x8x4xbf16, #tpu.memory_space<vmem>>, %arg3: memref<9x8x8xbf16, #tpu.memory_space<vmem>>, %arg4: memref<8x4xbf16, #tpu.memory_space<vmem>>, %arg5: memref<8x5xf32, #tpu.memory_space<vmem>>, %arg6: memref<9x256xf32, #tpu.memory_space<vmem>>, %arg7: memref<8x256xf32, #tpu.memory_space<vmem>>, %arg8: memref<8x512xf32, #tpu.memory_space<vmem>>) attributes {dimension_semantics = [#tpu.dimension_semantics<parallel>], iteration_bounds = array<i64: 2>, scalar_prefetch = 0 : i64, scratch_operands = 1 : i64, tpu.core_type = #tpu.core_type<tc>, window_params = [{transform_indices = @transform_0, window_bounds = array<i64: 4, 256>}, {pipeline_mode = #tpu.pipeline_mode<synchronous>, transform_indices = @transform_1, window_bounds = array<i64: 9, 8, 4>}, {pipeline_mode = #tpu.pipeline_mode<synchronous>, transform_indices = @transform_2, window_bounds = array<i64: 9, 8, 8>}, {pipeline_mode = #tpu.pipeline_mode<synchronous>, transform_indices = @transform_3, window_bounds = array<i64: 8, 4>}, {pipeline_mode = #tpu.pipeline_mode<synchronous>, transform_indices = @transform_4, window_bounds = array<i64: 8, 5>}, {pipeline_mode = #tpu.pipeline_mode<synchronous>, transform_indices = @transform_5, window_bounds = array<i64: 9, 256>}, {transform_indices = @transform_6, window_bounds = array<i64: 8, 256>}]} {
    %cst = arith.constant 0.000000e+00 : f32
    %0 = vector.broadcast %cst : f32 to vector<8x128xf32>
    %c0 = arith.constant 0 : index
    %c0_0 = arith.constant 0 : index
    %1 = vector.load %arg8[%c0, %c0_0] : memref<8x512xf32, #tpu.memory_space<vmem>>, vector<8x128xf32>
    tpu.vector_store %arg8[%c0, %c0_0], %0 {strides = array<i32>} : memref<8x512xf32, #tpu.memory_space<vmem>>, vector<8x128xf32>,
    %c0_1 = arith.constant 0 : index
    %c384 = arith.constant 384 : index
    %2 = vector.load %arg8[%c0_1, %c384] : memref<8x512xf32, #tpu.memory_space<vmem>>, vector<8x128xf32>
    tpu.vector_store %arg8[%c0_1, %c384], %0 {strides = array<i32>} : memref<8x512xf32, #tpu.memory_space<vmem>>, vector<8x128xf32>,
    %c0_2 = arith.constant 0 : index
    %c0_3 = arith.constant 0 : index
    %3 = vector.load %arg5[%c0_2, %c0_3] : memref<8x5xf32, #tpu.memory_space<vmem>>, vector<4x1xf32>
    %c0_4 = arith.constant 0 : index
    %c1 = arith.constant 1 : index
    %4 = vector.load %arg5[%c0_4, %c1] : memref<8x5xf32, #tpu.memory_space<vmem>>, vector<4x1xf32>
    %c0_5 = arith.constant 0 : index
    %c2 = arith.constant 2 : index
    %5 = vector.load %arg5[%c0_5, %c2] : memref<8x5xf32, #tpu.memory_space<vmem>>, vector<8x1xf32>
    %c0_6 = arith.constant 0 : index
    %c3 = arith.constant 3 : index
    %6 = vector.load %arg5[%c0_6, %c3] : memref<8x5xf32, #tpu.memory_space<vmem>>, vector<8x1xf32>
    %c0_7 = arith.constant 0 : index
    %c4 = arith.constant 4 : index
    %7 = vector.load %arg5[%c0_7, %c4] : memref<8x5xf32, #tpu.memory_space<vmem>>, vector<8x1xf32>
    %c0_8 = arith.constant 0 : index
    %c0_9 = arith.constant 0 : index
    %8 = vector.load %arg1[%c0_8, %c0_9] : memref<4x256xf32, #tpu.memory_space<vmem>>, vector<4x256xf32>
    %9 = vector.broadcast %3 : vector<4x1xf32> to vector<4x256xf32>
    %10 = arith.mulf %8, %9 : vector<4x256xf32>
    %11 = vector.broadcast %4 : vector<4x1xf32> to vector<4x256xf32>
    %12 = arith.addf %10, %11 : vector<4x256xf32>
    %cst_10 = arith.constant 0.000000e+00 : f32
    %13 = vector.broadcast %cst_10 : f32 to vector<4x256xf32>
    %14 = arith.maximumf %12, %13 : vector<4x256xf32>
    %c0_11 = arith.constant 0 : index
    %c128 = arith.constant 128 : index
    %15 = vector.load %arg8[%c0_11, %c128] : memref<8x512xf32, #tpu.memory_space<vmem>>, vector<4x256xf32>
    tpu.vector_store %arg8[%c0_11, %c128], %14 {strides = array<i32>} : memref<8x512xf32, #tpu.memory_space<vmem>>, vector<4x256xf32>,
    %c0_12 = arith.constant 0 : index
    %c111 = arith.constant 111 : index
    %16 = vector.load %arg8[%c0_12, %c111] : memref<8x512xf32, #tpu.memory_space<vmem>>, vector<4x256xf32>
    %c0_13 = arith.constant 0 : index
    %c0_14 = arith.constant 0 : index
    %17 = vector.load %arg6[%c0_13, %c0_14] : memref<9x256xf32, #tpu.memory_space<vmem>>, vector<1x256xf32>
    %18 = vector.broadcast %17 : vector<1x256xf32> to vector<4x256xf32>
    %19 = arith.mulf %16, %18 : vector<4x256xf32>
    %20 = arith.truncf %19 : vector<4x256xf32> to vector<4x256xbf16>
    %c0_15 = arith.constant 0 : index
    %c0_16 = arith.constant 0 : index
    %c0_17 = arith.constant 0 : index
    %21 = vector.load %arg2[%c0_15, %c0_16, %c0_17] : memref<9x8x4xbf16, #tpu.memory_space<vmem>>, vector<1x8x4xbf16>
    %22 = vector.shape_cast %21 : vector<1x8x4xbf16> to vector<8x4xbf16>
    %cst_18 = arith.constant dense<0.000000e+00> : vector<8x256xf32>
    %23 = tpu.matmul %22, %20, %cst_18 {dimension_numbers = #tpu.dot_dimension_numbers<[1], [0], [0], [1], [0, 0, 1, 1], [], []>} : vector<8x4xbf16>, vector<4x256xbf16>, vector<8x256xf32> -> vector<8x256xf32>
    %c0_19 = arith.constant 0 : index
    %c112 = arith.constant 112 : index
    %24 = vector.load %arg8[%c0_19, %c112] : memref<8x512xf32, #tpu.memory_space<vmem>>, vector<4x256xf32>
    %c1_20 = arith.constant 1 : index
    %c0_21 = arith.constant 0 : index
    %25 = vector.load %arg6[%c1_20, %c0_21] : memref<9x256xf32, #tpu.memory_space<vmem>>, vector<1x256xf32>
    %26 = vector.broadcast %25 : vector<1x256xf32> to vector<4x256xf32>
    %27 = arith.mulf %24, %26 : vector<4x256xf32>
    %28 = arith.truncf %27 : vector<4x256xf32> to vector<4x256xbf16>
    %c1_22 = arith.constant 1 : index
    %c0_23 = arith.constant 0 : index
    %c0_24 = arith.constant 0 : index
    %29 = vector.load %arg2[%c1_22, %c0_23, %c0_24] : memref<9x8x4xbf16, #tpu.memory_space<vmem>>, vector<1x8x4xbf16>
    %30 = vector.shape_cast %29 : vector<1x8x4xbf16> to vector<8x4xbf16>
    %cst_25 = arith.constant dense<0.000000e+00> : vector<8x256xf32>
    %31 = tpu.matmul %30, %28, %cst_25 {dimension_numbers = #tpu.dot_dimension_numbers<[1], [0], [0], [1], [0, 0, 1, 1], [], []>} : vector<8x4xbf16>, vector<4x256xbf16>, vector<8x256xf32> -> vector<8x256xf32>
    %32 = arith.addf %23, %31 : vector<8x256xf32>
    %c0_26 = arith.constant 0 : index
    %c113 = arith.constant 113 : index
    %33 = vector.load %arg8[%c0_26, %c113] : memref<8x512xf32, #tpu.memory_space<vmem>>, vector<4x256xf32>
    %c2_27 = arith.constant 2 : index
    %c0_28 = arith.constant 0 : index
    %34 = vector.load %arg6[%c2_27, %c0_28] : memref<9x256xf32, #tpu.memory_space<vmem>>, vector<1x256xf32>
    %35 = vector.broadcast %34 : vector<1x256xf32> to vector<4x256xf32>
    %36 = arith.mulf %33, %35 : vector<4x256xf32>
    %37 = arith.truncf %36 : vector<4x256xf32> to vector<4x256xbf16>
    %c2_29 = arith.constant 2 : index
    %c0_30 = arith.constant 0 : index
    %c0_31 = arith.constant 0 : index
    %38 = vector.load %arg2[%c2_29, %c0_30, %c0_31] : memref<9x8x4xbf16, #tpu.memory_space<vmem>>, vector<1x8x4xbf16>
    %39 = vector.shape_cast %38 : vector<1x8x4xbf16> to vector<8x4xbf16>
    %cst_32 = arith.constant dense<0.000000e+00> : vector<8x256xf32>
    %40 = tpu.matmul %39, %37, %cst_32 {dimension_numbers = #tpu.dot_dimension_numbers<[1], [0], [0], [1], [0, 0, 1, 1], [], []>} : vector<8x4xbf16>, vector<4x256xbf16>, vector<8x256xf32> -> vector<8x256xf32>
    %41 = arith.addf %32, %40 : vector<8x256xf32>
    %c0_33 = arith.constant 0 : index
    %c127 = arith.constant 127 : index
    %42 = vector.load %arg8[%c0_33, %c127] : memref<8x512xf32, #tpu.memory_space<vmem>>, vector<4x256xf32>
    %c3_34 = arith.constant 3 : index
    %c0_35 = arith.constant 0 : index
    %43 = vector.load %arg6[%c3_34, %c0_35] : memref<9x256xf32, #tpu.memory_space<vmem>>, vector<1x256xf32>
    %44 = vector.broadcast %43 : vector<1x256xf32> to vector<4x256xf32>
    %45 = arith.mulf %42, %44 : vector<4x256xf32>
    %46 = arith.truncf %45 : vector<4x256xf32> to vector<4x256xbf16>
    %c3_36 = arith.constant 3 : index
    %c0_37 = arith.constant 0 : index
    %c0_38 = arith.constant 0 : index
    %47 = vector.load %arg2[%c3_36, %c0_37, %c0_38] : memref<9x8x4xbf16, #tpu.memory_space<vmem>>, vector<1x8x4xbf16>
    %48 = vector.shape_cast %47 : vector<1x8x4xbf16> to vector<8x4xbf16>
    %cst_39 = arith.constant dense<0.000000e+00> : vector<8x256xf32>
    %49 = tpu.matmul %48, %46, %cst_39 {dimension_numbers = #tpu.dot_dimension_numbers<[1], [0], [0], [1], [0, 0, 1, 1], [], []>} : vector<8x4xbf16>, vector<4x256xbf16>, vector<8x256xf32> -> vector<8x256xf32>
    %50 = arith.addf %41, %49 : vector<8x256xf32>
    %c0_40 = arith.constant 0 : index
    %c128_41 = arith.constant 128 : index
    %51 = vector.load %arg8[%c0_40, %c128_41] : memref<8x512xf32, #tpu.memory_space<vmem>>, vector<4x256xf32>
    %52 = arith.truncf %51 : vector<4x256xf32> to vector<4x256xbf16>
    %c4_42 = arith.constant 4 : index
    %c0_43 = arith.constant 0 : index
    %c0_44 = arith.constant 0 : index
    %53 = vector.load %arg2[%c4_42, %c0_43, %c0_44] : memref<9x8x4xbf16, #tpu.memory_space<vmem>>, vector<1x8x4xbf16>
    %54 = vector.shape_cast %53 : vector<1x8x4xbf16> to vector<8x4xbf16>
    %cst_45 = arith.constant dense<0.000000e+00> : vector<8x256xf32>
    %55 = tpu.matmul %54, %52, %cst_45 {dimension_numbers = #tpu.dot_dimension_numbers<[1], [0], [0], [1], [0, 0, 1, 1], [], []>} : vector<8x4xbf16>, vector<4x256xbf16>, vector<8x256xf32> -> vector<8x256xf32>
    %56 = arith.addf %50, %55 : vector<8x256xf32>
    %c0_46 = arith.constant 0 : index
    %c129 = arith.constant 129 : index
    %57 = vector.load %arg8[%c0_46, %c129] : memref<8x512xf32, #tpu.memory_space<vmem>>, vector<4x256xf32>
    %c5 = arith.constant 5 : index
    %c0_47 = arith.constant 0 : index
    %58 = vector.load %arg6[%c5, %c0_47] : memref<9x256xf32, #tpu.memory_space<vmem>>, vector<1x256xf32>
    %59 = vector.broadcast %58 : vector<1x256xf32> to vector<4x256xf32>
    %60 = arith.mulf %57, %59 : vector<4x256xf32>
    %61 = arith.truncf %60 : vector<4x256xf32> to vector<4x256xbf16>
    %c5_48 = arith.constant 5 : index
    %c0_49 = arith.constant 0 : index
    %c0_50 = arith.constant 0 : index
    %62 = vector.load %arg2[%c5_48, %c0_49, %c0_50] : memref<9x8x4xbf16, #tpu.memory_space<vmem>>, vector<1x8x4xbf16>
    %63 = vector.shape_cast %62 : vector<1x8x4xbf16> to vector<8x4xbf16>
    %cst_51 = arith.constant dense<0.000000e+00> : vector<8x256xf32>
    %64 = tpu.matmul %63, %61, %cst_51 {dimension_numbers = #tpu.dot_dimension_numbers<[1], [0], [0], [1], [0, 0, 1, 1], [], []>} : vector<8x4xbf16>, vector<4x256xbf16>, vector<8x256xf32> -> vector<8x256xf32>
    %65 = arith.addf %56, %64 : vector<8x256xf32>
    %c0_52 = arith.constant 0 : index
    %c143 = arith.constant 143 : index
    %66 = vector.load %arg8[%c0_52, %c143] : memref<8x512xf32, #tpu.memory_space<vmem>>, vector<4x256xf32>
    %c6 = arith.constant 6 : index
    %c0_53 = arith.constant 0 : index
    %67 = vector.load %arg6[%c6, %c0_53] : memref<9x256xf32, #tpu.memory_space<vmem>>, vector<1x256xf32>
    %68 = vector.broadcast %67 : vector<1x256xf32> to vector<4x256xf32>
    %69 = arith.mulf %66, %68 : vector<4x256xf32>
    %70 = arith.truncf %69 : vector<4x256xf32> to vector<4x256xbf16>
    %c6_54 = arith.constant 6 : index
    %c0_55 = arith.constant 0 : index
    %c0_56 = arith.constant 0 : index
    %71 = vector.load %arg2[%c6_54, %c0_55, %c0_56] : memref<9x8x4xbf16, #tpu.memory_space<vmem>>, vector<1x8x4xbf16>
    %72 = vector.shape_cast %71 : vector<1x8x4xbf16> to vector<8x4xbf16>
    %cst_57 = arith.constant dense<0.000000e+00> : vector<8x256xf32>
    %73 = tpu.matmul %72, %70, %cst_57 {dimension_numbers = #tpu.dot_dimension_numbers<[1], [0], [0], [1], [0, 0, 1, 1], [], []>} : vector<8x4xbf16>, vector<4x256xbf16>, vector<8x256xf32> -> vector<8x256xf32>
    %74 = arith.addf %65, %73 : vector<8x256xf32>
    %c0_58 = arith.constant 0 : index
    %c144 = arith.constant 144 : index
    %75 = vector.load %arg8[%c0_58, %c144] : memref<8x512xf32, #tpu.memory_space<vmem>>, vector<4x256xf32>
    %c7 = arith.constant 7 : index
    %c0_59 = arith.constant 0 : index
    %76 = vector.load %arg6[%c7, %c0_59] : memref<9x256xf32, #tpu.memory_space<vmem>>, vector<1x256xf32>
    %77 = vector.broadcast %76 : vector<1x256xf32> to vector<4x256xf32>
    %78 = arith.mulf %75, %77 : vector<4x256xf32>
    %79 = arith.truncf %78 : vector<4x256xf32> to vector<4x256xbf16>
    %c7_60 = arith.constant 7 : index
    %c0_61 = arith.constant 0 : index
    %c0_62 = arith.constant 0 : index
    %80 = vector.load %arg2[%c7_60, %c0_61, %c0_62] : memref<9x8x4xbf16, #tpu.memory_space<vmem>>, vector<1x8x4xbf16>
    %81 = vector.shape_cast %80 : vector<1x8x4xbf16> to vector<8x4xbf16>
    %cst_63 = arith.constant dense<0.000000e+00> : vector<8x256xf32>
    %82 = tpu.matmul %81, %79, %cst_63 {dimension_numbers = #tpu.dot_dimension_numbers<[1], [0], [0], [1], [0, 0, 1, 1], [], []>} : vector<8x4xbf16>, vector<4x256xbf16>, vector<8x256xf32> -> vector<8x256xf32>
    %83 = arith.addf %74, %82 : vector<8x256xf32>
    %c0_64 = arith.constant 0 : index
    %c145 = arith.constant 145 : index
    %84 = vector.load %arg8[%c0_64, %c145] : memref<8x512xf32, #tpu.memory_space<vmem>>, vector<4x256xf32>
    %c8 = arith.constant 8 : index
    %c0_65 = arith.constant 0 : index
    %85 = vector.load %arg6[%c8, %c0_65] : memref<9x256xf32, #tpu.memory_space<vmem>>, vector<1x256xf32>
    %86 = vector.broadcast %85 : vector<1x256xf32> to vector<4x256xf32>
    %87 = arith.mulf %84, %86 : vector<4x256xf32>
    %88 = arith.truncf %87 : vector<4x256xf32> to vector<4x256xbf16>
    %c8_66 = arith.constant 8 : index
    %c0_67 = arith.constant 0 : index
    %c0_68 = arith.constant 0 : index
    %89 = vector.load %arg2[%c8_66, %c0_67, %c0_68] : memref<9x8x4xbf16, #tpu.memory_space<vmem>>, vector<1x8x4xbf16>
    %90 = vector.shape_cast %89 : vector<1x8x4xbf16> to vector<8x4xbf16>
    %cst_69 = arith.constant dense<0.000000e+00> : vector<8x256xf32>
    %91 = tpu.matmul %90, %88, %cst_69 {dimension_numbers = #tpu.dot_dimension_numbers<[1], [0], [0], [1], [0, 0, 1, 1], [], []>} : vector<8x4xbf16>, vector<4x256xbf16>, vector<8x256xf32> -> vector<8x256xf32>
    %92 = arith.addf %83, %91 : vector<8x256xf32>
    %93 = vector.broadcast %5 : vector<8x1xf32> to vector<8x256xf32>
    %94 = arith.mulf %92, %93 : vector<8x256xf32>
    %95 = vector.broadcast %6 : vector<8x1xf32> to vector<8x256xf32>
    %96 = arith.addf %94, %95 : vector<8x256xf32>
    %cst_70 = arith.constant 0.000000e+00 : f32
    %97 = vector.broadcast %cst_70 : f32 to vector<8x256xf32>
    %98 = arith.maximumf %96, %97 : vector<8x256xf32>
    %c0_71 = arith.constant 0 : index
    %c128_72 = arith.constant 128 : index
    %99 = vector.load %arg8[%c0_71, %c128_72] : memref<8x512xf32, #tpu.memory_space<vmem>>, vector<8x256xf32>
    tpu.vector_store %arg8[%c0_71, %c128_72], %98 {strides = array<i32>} : memref<8x512xf32, #tpu.memory_space<vmem>>, vector<8x256xf32>,
    %c0_73 = arith.constant 0 : index
    %c111_74 = arith.constant 111 : index
    %100 = vector.load %arg8[%c0_73, %c111_74] : memref<8x512xf32, #tpu.memory_space<vmem>>, vector<8x256xf32>
    %c0_75 = arith.constant 0 : index
    %c0_76 = arith.constant 0 : index
    %101 = vector.load %arg6[%c0_75, %c0_76] : memref<9x256xf32, #tpu.memory_space<vmem>>, vector<1x256xf32>
    %102 = vector.broadcast %101 : vector<1x256xf32> to vector<8x256xf32>
    %103 = arith.mulf %100, %102 : vector<8x256xf32>
    %104 = arith.truncf %103 : vector<8x256xf32> to vector<8x256xbf16>
    %c0_77 = arith.constant 0 : index
    %c0_78 = arith.constant 0 : index
    %c0_79 = arith.constant 0 : index
    %105 = vector.load %arg3[%c0_77, %c0_78, %c0_79] : memref<9x8x8xbf16, #tpu.memory_space<vmem>>, vector<1x8x8xbf16>
    %106 = vector.shape_cast %105 : vector<1x8x8xbf16> to vector<8x8xbf16>
    %cst_80 = arith.constant dense<0.000000e+00> : vector<8x256xf32>
    %107 = tpu.matmul %106, %104, %cst_80 {dimension_numbers = #tpu.dot_dimension_numbers<[1], [0], [0], [1], [0, 0, 1, 1], [], []>} : vector<8x8xbf16>, vector<8x256xbf16>, vector<8x256xf32> -> vector<8x256xf32>
    %c0_81 = arith.constant 0 : index
    %c112_82 = arith.constant 112 : index
    %108 = vector.load %arg8[%c0_81, %c112_82] : memref<8x512xf32, #tpu.memory_space<vmem>>, vector<8x256xf32>
    %c1_83 = arith.constant 1 : index
    %c0_84 = arith.constant 0 : index
    %109 = vector.load %arg6[%c1_83, %c0_84] : memref<9x256xf32, #tpu.memory_space<vmem>>, vector<1x256xf32>
    %110 = vector.broadcast %109 : vector<1x256xf32> to vector<8x256xf32>
    %111 = arith.mulf %108, %110 : vector<8x256xf32>
    %112 = arith.truncf %111 : vector<8x256xf32> to vector<8x256xbf16>
    %c1_85 = arith.constant 1 : index
    %c0_86 = arith.constant 0 : index
    %c0_87 = arith.constant 0 : index
    %113 = vector.load %arg3[%c1_85, %c0_86, %c0_87] : memref<9x8x8xbf16, #tpu.memory_space<vmem>>, vector<1x8x8xbf16>
    %114 = vector.shape_cast %113 : vector<1x8x8xbf16> to vector<8x8xbf16>
    %cst_88 = arith.constant dense<0.000000e+00> : vector<8x256xf32>
    %115 = tpu.matmul %114, %112, %cst_88 {dimension_numbers = #tpu.dot_dimension_numbers<[1], [0], [0], [1], [0, 0, 1, 1], [], []>} : vector<8x8xbf16>, vector<8x256xbf16>, vector<8x256xf32> -> vector<8x256xf32>
    %116 = arith.addf %107, %115 : vector<8x256xf32>
    %c0_89 = arith.constant 0 : index
    %c113_90 = arith.constant 113 : index
    %117 = vector.load %arg8[%c0_89, %c113_90] : memref<8x512xf32, #tpu.memory_space<vmem>>, vector<8x256xf32>
    %c2_91 = arith.constant 2 : index
    %c0_92 = arith.constant 0 : index
    %118 = vector.load %arg6[%c2_91, %c0_92] : memref<9x256xf32, #tpu.memory_space<vmem>>, vector<1x256xf32>
    %119 = vector.broadcast %118 : vector<1x256xf32> to vector<8x256xf32>
    %120 = arith.mulf %117, %119 : vector<8x256xf32>
    %121 = arith.truncf %120 : vector<8x256xf32> to vector<8x256xbf16>
    %c2_93 = arith.constant 2 : index
    %c0_94 = arith.constant 0 : index
    %c0_95 = arith.constant 0 : index
    %122 = vector.load %arg3[%c2_93, %c0_94, %c0_95] : memref<9x8x8xbf16, #tpu.memory_space<vmem>>, vector<1x8x8xbf16>
    %123 = vector.shape_cast %122 : vector<1x8x8xbf16> to vector<8x8xbf16>
    %cst_96 = arith.constant dense<0.000000e+00> : vector<8x256xf32>
    %124 = tpu.matmul %123, %121, %cst_96 {dimension_numbers = #tpu.dot_dimension_numbers<[1], [0], [0], [1], [0, 0, 1, 1], [], []>} : vector<8x8xbf16>, vector<8x256xbf16>, vector<8x256xf32> -> vector<8x256xf32>
    %125 = arith.addf %116, %124 : vector<8x256xf32>
    %c0_97 = arith.constant 0 : index
    %c127_98 = arith.constant 127 : index
    %126 = vector.load %arg8[%c0_97, %c127_98] : memref<8x512xf32, #tpu.memory_space<vmem>>, vector<8x256xf32>
    %c3_99 = arith.constant 3 : index
    %c0_100 = arith.constant 0 : index
    %127 = vector.load %arg6[%c3_99, %c0_100] : memref<9x256xf32, #tpu.memory_space<vmem>>, vector<1x256xf32>
    %128 = vector.broadcast %127 : vector<1x256xf32> to vector<8x256xf32>
    %129 = arith.mulf %126, %128 : vector<8x256xf32>
    %130 = arith.truncf %129 : vector<8x256xf32> to vector<8x256xbf16>
    %c3_101 = arith.constant 3 : index
    %c0_102 = arith.constant 0 : index
    %c0_103 = arith.constant 0 : index
    %131 = vector.load %arg3[%c3_101, %c0_102, %c0_103] : memref<9x8x8xbf16, #tpu.memory_space<vmem>>, vector<1x8x8xbf16>
    %132 = vector.shape_cast %131 : vector<1x8x8xbf16> to vector<8x8xbf16>
    %cst_104 = arith.constant dense<0.000000e+00> : vector<8x256xf32>
    %133 = tpu.matmul %132, %130, %cst_104 {dimension_numbers = #tpu.dot_dimension_numbers<[1], [0], [0], [1], [0, 0, 1, 1], [], []>} : vector<8x8xbf16>, vector<8x256xbf16>, vector<8x256xf32> -> vector<8x256xf32>
    %134 = arith.addf %125, %133 : vector<8x256xf32>
    %c0_105 = arith.constant 0 : index
    %c128_106 = arith.constant 128 : index
    %135 = vector.load %arg8[%c0_105, %c128_106] : memref<8x512xf32, #tpu.memory_space<vmem>>, vector<8x256xf32>
    %136 = arith.truncf %135 : vector<8x256xf32> to vector<8x256xbf16>
    %c4_107 = arith.constant 4 : index
    %c0_108 = arith.constant 0 : index
    %c0_109 = arith.constant 0 : index
    %137 = vector.load %arg3[%c4_107, %c0_108, %c0_109] : memref<9x8x8xbf16, #tpu.memory_space<vmem>>, vector<1x8x8xbf16>
    %138 = vector.shape_cast %137 : vector<1x8x8xbf16> to vector<8x8xbf16>
    %cst_110 = arith.constant dense<0.000000e+00> : vector<8x256xf32>
    %139 = tpu.matmul %138, %136, %cst_110 {dimension_numbers = #tpu.dot_dimension_numbers<[1], [0], [0], [1], [0, 0, 1, 1], [], []>} : vector<8x8xbf16>, vector<8x256xbf16>, vector<8x256xf32> -> vector<8x256xf32>
    %140 = arith.addf %134, %139 : vector<8x256xf32>
    %c0_111 = arith.constant 0 : index
    %c129_112 = arith.constant 129 : index
    %141 = vector.load %arg8[%c0_111, %c129_112] : memref<8x512xf32, #tpu.memory_space<vmem>>, vector<8x256xf32>
    %c5_113 = arith.constant 5 : index
    %c0_114 = arith.constant 0 : index
    %142 = vector.load %arg6[%c5_113, %c0_114] : memref<9x256xf32, #tpu.memory_space<vmem>>, vector<1x256xf32>
    %143 = vector.broadcast %142 : vector<1x256xf32> to vector<8x256xf32>
    %144 = arith.mulf %141, %143 : vector<8x256xf32>
    %145 = arith.truncf %144 : vector<8x256xf32> to vector<8x256xbf16>
    %c5_115 = arith.constant 5 : index
    %c0_116 = arith.constant 0 : index
    %c0_117 = arith.constant 0 : index
    %146 = vector.load %arg3[%c5_115, %c0_116, %c0_117] : memref<9x8x8xbf16, #tpu.memory_space<vmem>>, vector<1x8x8xbf16>
    %147 = vector.shape_cast %146 : vector<1x8x8xbf16> to vector<8x8xbf16>
    %cst_118 = arith.constant dense<0.000000e+00> : vector<8x256xf32>
    %148 = tpu.matmul %147, %145, %cst_118 {dimension_numbers = #tpu.dot_dimension_numbers<[1], [0], [0], [1], [0, 0, 1, 1], [], []>} : vector<8x8xbf16>, vector<8x256xbf16>, vector<8x256xf32> -> vector<8x256xf32>
    %149 = arith.addf %140, %148 : vector<8x256xf32>
    %c0_119 = arith.constant 0 : index
    %c143_120 = arith.constant 143 : index
    %150 = vector.load %arg8[%c0_119, %c143_120] : memref<8x512xf32, #tpu.memory_space<vmem>>, vector<8x256xf32>
    %c6_121 = arith.constant 6 : index
    %c0_122 = arith.constant 0 : index
    %151 = vector.load %arg6[%c6_121, %c0_122] : memref<9x256xf32, #tpu.memory_space<vmem>>, vector<1x256xf32>
    %152 = vector.broadcast %151 : vector<1x256xf32> to vector<8x256xf32>
    %153 = arith.mulf %150, %152 : vector<8x256xf32>
    %154 = arith.truncf %153 : vector<8x256xf32> to vector<8x256xbf16>
    %c6_123 = arith.constant 6 : index
    %c0_124 = arith.constant 0 : index
    %c0_125 = arith.constant 0 : index
    %155 = vector.load %arg3[%c6_123, %c0_124, %c0_125] : memref<9x8x8xbf16, #tpu.memory_space<vmem>>, vector<1x8x8xbf16>
    %156 = vector.shape_cast %155 : vector<1x8x8xbf16> to vector<8x8xbf16>
    %cst_126 = arith.constant dense<0.000000e+00> : vector<8x256xf32>
    %157 = tpu.matmul %156, %154, %cst_126 {dimension_numbers = #tpu.dot_dimension_numbers<[1], [0], [0], [1], [0, 0, 1, 1], [], []>} : vector<8x8xbf16>, vector<8x256xbf16>, vector<8x256xf32> -> vector<8x256xf32>
    %158 = arith.addf %149, %157 : vector<8x256xf32>
    %c0_127 = arith.constant 0 : index
    %c144_128 = arith.constant 144 : index
    %159 = vector.load %arg8[%c0_127, %c144_128] : memref<8x512xf32, #tpu.memory_space<vmem>>, vector<8x256xf32>
    %c7_129 = arith.constant 7 : index
    %c0_130 = arith.constant 0 : index
    %160 = vector.load %arg6[%c7_129, %c0_130] : memref<9x256xf32, #tpu.memory_space<vmem>>, vector<1x256xf32>
    %161 = vector.broadcast %160 : vector<1x256xf32> to vector<8x256xf32>
    %162 = arith.mulf %159, %161 : vector<8x256xf32>
    %163 = arith.truncf %162 : vector<8x256xf32> to vector<8x256xbf16>
    %c7_131 = arith.constant 7 : index
    %c0_132 = arith.constant 0 : index
    %c0_133 = arith.constant 0 : index
    %164 = vector.load %arg3[%c7_131, %c0_132, %c0_133] : memref<9x8x8xbf16, #tpu.memory_space<vmem>>, vector<1x8x8xbf16>
    %165 = vector.shape_cast %164 : vector<1x8x8xbf16> to vector<8x8xbf16>
    %cst_134 = arith.constant dense<0.000000e+00> : vector<8x256xf32>
    %166 = tpu.matmul %165, %163, %cst_134 {dimension_numbers = #tpu.dot_dimension_numbers<[1], [0], [0], [1], [0, 0, 1, 1], [], []>} : vector<8x8xbf16>, vector<8x256xbf16>, vector<8x256xf32> -> vector<8x256xf32>
    %167 = arith.addf %158, %166 : vector<8x256xf32>
    %c0_135 = arith.constant 0 : index
    %c145_136 = arith.constant 145 : index
    %168 = vector.load %arg8[%c0_135, %c145_136] : memref<8x512xf32, #tpu.memory_space<vmem>>, vector<8x256xf32>
    %c8_137 = arith.constant 8 : index
    %c0_138 = arith.constant 0 : index
    %169 = vector.load %arg6[%c8_137, %c0_138] : memref<9x256xf32, #tpu.memory_space<vmem>>, vector<1x256xf32>
    %170 = vector.broadcast %169 : vector<1x256xf32> to vector<8x256xf32>
    %171 = arith.mulf %168, %170 : vector<8x256xf32>
    %172 = arith.truncf %171 : vector<8x256xf32> to vector<8x256xbf16>
    %c8_139 = arith.constant 8 : index
    %c0_140 = arith.constant 0 : index
    %c0_141 = arith.constant 0 : index
    %173 = vector.load %arg3[%c8_139, %c0_140, %c0_141] : memref<9x8x8xbf16, #tpu.memory_space<vmem>>, vector<1x8x8xbf16>
    %174 = vector.shape_cast %173 : vector<1x8x8xbf16> to vector<8x8xbf16>
    %cst_142 = arith.constant dense<0.000000e+00> : vector<8x256xf32>
    %175 = tpu.matmul %174, %172, %cst_142 {dimension_numbers = #tpu.dot_dimension_numbers<[1], [0], [0], [1], [0, 0, 1, 1], [], []>} : vector<8x8xbf16>, vector<8x256xbf16>, vector<8x256xf32> -> vector<8x256xf32>
    %176 = arith.addf %167, %175 : vector<8x256xf32>
    %177 = vector.broadcast %7 : vector<8x1xf32> to vector<8x256xf32>
    %178 = arith.addf %176, %177 : vector<8x256xf32>
    %c0_143 = arith.constant 0 : index
    %c0_144 = arith.constant 0 : index
    %179 = vector.load %arg1[%c0_143, %c0_144] : memref<4x256xf32, #tpu.memory_space<vmem>>, vector<4x256xf32>
    %180 = arith.truncf %179 : vector<4x256xf32> to vector<4x256xbf16>
    %c0_145 = arith.constant 0 : index
    %c0_146 = arith.constant 0 : index
    %181 = vector.load %arg4[%c0_145, %c0_146] : memref<8x4xbf16, #tpu.memory_space<vmem>>, vector<8x4xbf16>
    %cst_147 = arith.constant dense<0.000000e+00> : vector<8x256xf32>
    %182 = tpu.matmul %181, %180, %cst_147 {dimension_numbers = #tpu.dot_dimension_numbers<[1], [0], [0], [1], [0, 0, 1, 1], [], []>} : vector<8x4xbf16>, vector<4x256xbf16>, vector<8x256xf32> -> vector<8x256xf32>
    %183 = arith.addf %178, %182 : vector<8x256xf32>
    %c0_148 = arith.constant 0 : index
    %c0_149 = arith.constant 0 : index
    %184 = vector.load %arg7[%c0_148, %c0_149] : memref<8x256xf32, #tpu.memory_space<vmem>>, vector<8x256xf32>
    tpu.vector_store %arg7[%c0_148, %c0_149], %183 {strides = array<i32>} : memref<8x256xf32, #tpu.memory_space<vmem>>, vector<8x256xf32>,
    return
  }
  func.func @transform_0(%arg0: i32) -> (i32, i32) {
    %c0_i32 = arith.constant 0 : i32
    %c0_i32_0 = arith.constant 0 : i32
    return %c0_i32, %arg0 : i32, i32
  }
  func.func @transform_1(%arg0: i32) -> (i32, i32, i32) {
    %c0_i32 = arith.constant 0 : i32
    %c0_i32_0 = arith.constant 0 : i32
    %c0_i32_1 = arith.constant 0 : i32
    %c0_i32_2 = arith.constant 0 : i32
    return %c0_i32, %c0_i32_0, %c0_i32_1 : i32, i32, i32
  }
  func.func @transform_2(%arg0: i32) -> (i32, i32, i32) {
    %c0_i32 = arith.constant 0 : i32
    %c0_i32_0 = arith.constant 0 : i32
    %c0_i32_1 = arith.constant 0 : i32
    %c0_i32_2 = arith.constant 0 : i32
    return %c0_i32, %c0_i32_0, %c0_i32_1 : i32, i32, i32
  }
  func.func @transform_3(%arg0: i32) -> (i32, i32) {
    %c0_i32 = arith.constant 0 : i32
    %c0_i32_0 = arith.constant 0 : i32
    %c0_i32_1 = arith.constant 0 : i32
    return %c0_i32, %c0_i32_0 : i32, i32
  }
  func.func @transform_4(%arg0: i32) -> (i32, i32) {
    %c0_i32 = arith.constant 0 : i32
    %c0_i32_0 = arith.constant 0 : i32
    %c0_i32_1 = arith.constant 0 : i32
    return %c0_i32, %c0_i32_0 : i32, i32
  }
  func.func @transform_5(%arg0: i32) -> (i32, i32) {
    %c0_i32 = arith.constant 0 : i32
    %c0_i32_0 = arith.constant 0 : i32
    %c0_i32_1 = arith.constant 0 : i32
    return %c0_i32, %c0_i32_0 : i32, i32
  }
  func.func @transform_6(%arg0: i32) -> (i32, i32) {
    %c0_i32 = arith.constant 0 : i32
    %c0_i32_0 = arith.constant 0 : i32
    return %c0_i32, %arg0 : i32, i32
  }
}

</mosaic_0001>

<bundles_post_ra>
// kernel: tpu_custom_call.1
= control target key start
LH: loop header
LB: loop body
LE: loop exit
PB: predicated region body
PF: predicated region fallthrough
CT: control target
= control target key end

     0   :  { %11 = vsyncpa [#allocation4], 0  ;;  %s3350_s0 = inlined_call_operand.hbm [shape: f32[4,512], index: 0, kind: input, shape index: {}]   ;;  %s3351_s1 = inlined_call_operand.hbm [shape: bf16[9,8,4], index: 1, kind: input, shape index: {}]   ;;  %s3352_s2 = inlined_call_operand.hbm [shape: bf16[9,8,8], index: 2, kind: input, shape index: {}]   ;;  %s3353_s3 = inlined_call_operand.hbm [shape: bf16[8,4], index: 3, kind: input, shape index: {}]   ;;  %s3354_s4 = inlined_call_operand.hbm [shape: f32[8,5], index: 4, kind: input, shape index: {}]   ;;  %s3355_s5 = inlined_call_operand.hbm [shape: f32[9,256], index: 5, kind: input, shape index: {}]   ;;  %s3356_s6 = inlined_call_operand.hbm [shape: f32[8,512], index: 6, kind: output, shape index: {}]  }
   0x1   :  { %13 = vsyncpa [#allocation4 + $0x1], 0 }
   0x2   :  { %14 = vsyncpa [#allocation7], 0 }
   0x3   :  { %15 = vsyncpa [#allocation10], 0 }
   0x4   :  { %16 = vsyncpa [#allocation13], 0 }
   0x5   :  { %17 = vsyncpa [#allocation5], 0 }
   0x6   :  { %19 = vsyncpa [#allocation5 + $0x1], 0  ;;  %s2725_s21 = smov 0   ;;  %s2727_s22 = smov 0  }
   0x7   :  { %s2729_s23 = smov 0   ;;  %s2731_s24 = smov 0  }
   0x8 LB: > { %s2664_s25 = smov [#allocation6]   ;;  %s2746_s27 = sadd.s32 4294967295, %s2662_s24   ;;  %s2662_s24 = sphi %s2731_s24, %s3381_s24   ;;  %s2658_s23 = sphi %s2729_s23, %s3380_s23   ;;  %s2654_s22 = sphi %s2727_s22, %s3379_s22   ;;  %s2650_s21 = sphi %s2725_s21, %s3378_s21  }
   0x9   : > { %s199_s26 = sshll.u32 %s2664_s25, 4  ;;  %p2159_p0 = scmp.ge.s32.totalorder %s2662_s24, 1  ;;  %s2751_s26 = int_to_ptr.vmem [resolvable:$true] %s199_s26 }
   0xa   : > { %p3357_p1 = scmp.eq.s32.totalorder %s2746_s27, 0  ;;  %p187_p2 = scmp.lt.s32.totalorder %s2662_s24, 3 }
   0xb   : > { %s2665_s29 = smov [#allocation9]   ;;  %s2666_s8 = smov [#allocation8]  }
   0xc   : > { %p2753_p3 = pnand %p2159_p0, %p187_p2  ;;  %s226_s30 = sshll.u32 %s2665_s29, 4  ;;  %s2766_s30 = int_to_ptr.vmem [resolvable:$true] %s226_s30 }
   0xd   : > { %s212_s9 = sshll.u32 %s2666_s8, 4  ;;  %s2414_s12 = scalar_lea.hbm %s3351_s1, 576  ;;  %s2768_s9 = int_to_ptr.vmem [resolvable:$true] %s212_s9 }
   0xe   : > { %s3360_s28 = scalar_select %p2753_p3, 1, 0 }
   0xf   : > { %p2316_p5 = pneg %p2753_p3  ;;  %p2415_p7 = scmp.ne.s32.totalorder %s3351_s1, %s2414_s12 }
  0x10   : > { %p2421_p11 = scmp.lt.u32.totalorder %s2414_s12, %s3351_s1 }
  0x11   : > { %p2762_p6 = pnand %p2316_p5, %p3357_p1 }
  0x13   : > { %p2778_p8 = pneg %p2762_p6 }
  0x15   : > { %p2417_p9 = pnand %p2778_p8, %p2415_p7 }
  0x17   : > { %p2418_p10 = pneg %p2417_p9 }
  0x19   : > { %p2423_p12 = pnand %p2421_p11, %p2418_p10 }
  0x1b   : > { %2426 = shalt.err (!%p2423_p12)
}
  0x1c   : > { %s2427_s18 = scalar_lea.vmem %s2751_s26, 576  ;;  %p2435_p5 = scmp.lt.s32.totalorder %s2751_s26, %s2751_s26 }
  0x1d   : > { %p2428_p13 = scmp.ne.s32.totalorder %s2751_s26, %s2427_s18  ;;  %p2436_p4 = scmp.lt.s32.totalorder %s2427_s18, %s2427_s18 }
  0x1f   : > { %p2430_p0 = pnand %p2428_p13, %p2778_p8  ;;  %p2437_p7 = por %p2436_p4, %p2435_p5 }
  0x21   : > { %p2431_p2 = pneg %p2430_p0 }
  0x23   : > { %p2438_p9 = pnand %p2437_p7, %p2431_p2 }
  0x25   : > { %2441 = shalt.err (!%p2438_p9)
}
  0x26   : > { %s2667_s19 = smov 64   ;;  %s2668_s20 = smov 4  }
  0x27   : > { %2319 = dma.hbm_to_vmem [thread:$0]  (!%p2762_p6), %s3351_s1, 576, %s2751_s26, [#allocation7], %s2667_s19, %s2667_s19, %s2668_s20  }
  0x28   : > { %s2442_s11 = scalar_lea.hbm %s3353_s3, 64 }
  0x29   : > { %p2443_p4 = scmp.ne.s32.totalorder %s3353_s3, %s2442_s11  ;;  %p2449_p12 = scmp.lt.u32.totalorder %s2442_s11, %s3353_s3 }
  0x2b   : > { %p2445_p10 = pnand %p2443_p4, %p2778_p8 }
  0x2d   : > { %p2446_p11 = pneg %p2445_p10 }
  0x2f   : > { %p2451_p13 = pnand %p2449_p12, %p2446_p11 }
  0x31   : > { %2454 = shalt.err (!%p2451_p13)
}
  0x32   : > { %s2455_s26 = scalar_lea.vmem %s2766_s30, 64  ;;  %p2463_p7 = scmp.lt.s32.totalorder %s2766_s30, %s2766_s30 }
  0x33   : > { %p2456_p0 = scmp.ne.s32.totalorder %s2766_s30, %s2455_s26  ;;  %p2464_p9 = scmp.lt.s32.totalorder %s2455_s26, %s2455_s26 }
  0x35   : > { %p2458_p2 = pnand %p2456_p0, %p2778_p8  ;;  %p2465_p4 = por %p2464_p9, %p2463_p7 }
  0x37   : > { %p2459_p5 = pneg %p2458_p2 }
  0x39   : > { %p2466_p10 = pnand %p2465_p4, %p2459_p5 }
  0x3b   : > { %2469 = shalt.err (!%p2466_p10)
}
  0x3c   : > { %2325 = dma.hbm_to_vmem [thread:$0]  (!%p2762_p6), %s3353_s3, 64, %s2766_s30, [#allocation10]  }
  0x3d   : > { %s2470_s8 = scalar_lea.hbm %s3352_s2, 576 }
  0x3e   : > { %p2471_p11 = scmp.ne.s32.totalorder %s3352_s2, %s2470_s8  ;;  %p2477_p0 = scmp.lt.u32.totalorder %s2470_s8, %s3352_s2 }
  0x40   : > { %p2473_p12 = pnand %p2471_p11, %p2778_p8 }
  0x42   : > { %p2474_p13 = pneg %p2473_p12 }
  0x44   : > { %p2479_p2 = pnand %p2477_p0, %p2474_p13 }
  0x46   : > { %2482 = shalt.err (!%p2479_p2)
}
  0x47   : > { %s2483_s30 = scalar_lea.vmem %s2768_s9, 576  ;;  %p2491_p4 = scmp.lt.s32.totalorder %s2768_s9, %s2768_s9 }
  0x48   : > { %p2484_p5 = scmp.ne.s32.totalorder %s2768_s9, %s2483_s30  ;;  %p2492_p10 = scmp.lt.s32.totalorder %s2483_s30, %s2483_s30 }
  0x4a   : > { %p2486_p7 = pnand %p2484_p5, %p2778_p8  ;;  %p2493_p11 = por %p2492_p10, %p2491_p4 }
  0x4c   : > { %p2487_p9 = pneg %p2486_p7 }
  0x4e   : > { %p2494_p12 = pnand %p2493_p11, %p2487_p9 }
  0x50   : > { %2497 = shalt.err (!%p2494_p12)
}
  0x51   : > { %2322 = dma.hbm_to_vmem [thread:$0]  (!%p2762_p6), %s3352_s2, 576, %s2768_s9, [#allocation7], %s2667_s19, %s2667_s19, %s2668_s20  }
  0x52   : > { %s2669_s26 = smov [#allocation11]   ;;  %s2670_s18 = smov [#allocation12]  }
  0x53   : > { %s237_s17 = sshll.u32 %s2669_s26, 4  ;;  %s247_s25 = sshll.u32 %s2670_s18, 4  ;;  %s238_s17 = int_to_ptr.vmem [resolvable:$true] %s237_s17  ;;  %s248_s25 = int_to_ptr.vmem [resolvable:$true] %s247_s25 }
  0x54   : > { %s2498_s10 = scalar_lea.hbm %s3354_s4, 128 }
  0x55   : > { %p2499_p13 = scmp.ne.s32.totalorder %s3354_s4, %s2498_s10  ;;  %p2505_p5 = scmp.lt.u32.totalorder %s2498_s10, %s3354_s4 }
  0x57   : > { %p2501_p0 = pnand %p2499_p13, %p2778_p8 }
  0x59   : > { %p2502_p2 = pneg %p2501_p0 }
  0x5b   : > { %p2507_p7 = pnand %p2505_p5, %p2502_p2 }
  0x5d   : > { %2510 = shalt.err (!%p2507_p7)
}
  0x5e   : > { %s2511_s9 = scalar_lea.vmem %s238_s17, 128  ;;  %p2519_p11 = scmp.lt.s32.totalorder %s238_s17, %s238_s17 }
  0x5f   : > { %p2512_p9 = scmp.ne.s32.totalorder %s238_s17, %s2511_s9  ;;  %p2520_p12 = scmp.lt.s32.totalorder %s2511_s9, %s2511_s9 }
  0x61   : > { %p2514_p4 = pnand %p2512_p9, %p2778_p8  ;;  %p2521_p1 = por %p2520_p12, %p2519_p11 }
  0x63   : > { %p2515_p10 = pneg %p2514_p4 }
  0x65   : > { %p2522_p3 = pnand %p2521_p1, %p2515_p10 }
  0x67   : > { %2525 = shalt.err (!%p2522_p3)
}
  0x68   : > { %2328 = dma.hbm_to_vmem [thread:$0]  (!%p2762_p6), %s3354_s4, 128, %s238_s17, [#allocation10]  }
  0x69   : > { %s2526_s26 = scalar_lea.hbm %s3355_s5, 512 }
  0x6a   : > { %p2527_p13 = scmp.ne.s32.totalorder %s3355_s5, %s2526_s26  ;;  %p2533_p3 = scmp.lt.u32.totalorder %s2526_s26, %s3355_s5 }
  0x6c   : > { %p2529_p0 = pnand %p2527_p13, %p2778_p8 }
  0x6e   : > { %p2530_p1 = pneg %p2529_p0 }
  0x70   : > { %p2535_p2 = pnand %p2533_p3, %p2530_p1 }
  0x72   : > { %2538 = shalt.err (!%p2535_p2)
}
  0x73   : > { %s2539_s11 = scalar_lea.vmem %s248_s25, 512  ;;  %p2547_p4 = scmp.lt.s32.totalorder %s248_s25, %s248_s25 }
  0x74   : > { %p2540_p5 = scmp.ne.s32.totalorder %s248_s25, %s2539_s11  ;;  %p2548_p10 = scmp.lt.s32.totalorder %s2539_s11, %s2539_s11 }
  0x76   : > { %p2542_p7 = pnand %p2540_p5, %p2778_p8  ;;  %p2549_p11 = por %p2548_p10, %p2547_p4 }
  0x78   : > { %p2543_p9 = pneg %p2542_p7 }
  0x7a   : > { %p2550_p12 = pnand %p2549_p11, %p2543_p9 }
  0x7c   : > { %2553 = shalt.err (!%p2550_p12)
}
  0x7d   : > { %s2671_s17 = smov 256   ;;  %s2672_s15 = smov 16  }
  0x7e   : > { %2331 = dma.hbm_to_vmem [thread:$0]  (!%p2762_p6), %s3355_s5, 512, %s248_s25, [#allocation13], %s2671_s17, %s2671_s17, %s2672_s15  }
  0x7f   : > { %s2158_s30 = sadd.s32 4294967294, %s2662_s24   ;;  %s2889_s9 = sadd.s32 1, %s2662_s24  }
  0x80   : > { %s32_s19 = sadd.s32 1, %s2658_s23  ;;  %s29_s20 = ssub.s32 %s2662_s24, %s2889_s9 }
  0x81   : > { %p39_p8 = scmp.ne.s32.totalorder %s2658_s23, %s2654_s22  ;;  %p30_p13 = scmp.eq.s32.totalorder %s29_s20, 0 }
  0x82   : > { %p40_p0 = scmp.eq.s32.totalorder %s2662_s24, 0  ;;  %p45_p1 = scmp.ne.s32.totalorder %s2654_s22, %s2650_s21 }
  0x83   : > { %p174_p3 = scmp.eq.s32.totalorder %s2746_s27, 1  ;;  %p3363_p5 = scmp.eq.s32.totalorder %s2746_s27, 0 }
  0x84   : > { %s2901_s14 = scalar_select %p30_p13, %s2658_s23, %s32_s19  }
  0x85   : > { %p41_p2 = por %p40_p0, %p39_p8  ;;  %p2905_p7 = por %p3363_p5, %p45_p1 }
  0x86   : > { %p2909_p6 = por %p174_p3, %p39_p8  ;;  %p180_p9 = scmp.eq.s32.totalorder %s2158_s30, 1 }
  0x87   : > { %p2345_p4 = scmp.lt.s32.totalorder %s2662_s24, 2  ;;  %s261_s16 = sand.u32 1, %s2658_s23  }
  0x88   : > { %s3365_s25 = scalar_select %p2909_p6, 1, 0 }
  0x89   : > { %p2915_p10 = por %p180_p9, %p45_p1  ;;  %s2166_s18 = sshll.u32 %s261_s16, 3 }
  0x8a   : > { %s2220_s29 = sshll.u32 %s2662_s24, 7  ;;  %s265_s17 = scalar_lea.vmem [#allocation3], %s2166_s18 }
  0x8b   : > { %s3366_s26 = scalar_select %p2915_p10, 1, 0 }
  0x8c   : > { %s2923_s11 = scalar_lea.hbm %s3350_s0, %s2220_s29  ;;  %s273_s15 = sshll.u32 %s265_s17, 4  ;;  %s2929_s15 = int_to_ptr.vmem [resolvable:$true] %s273_s15 }
  0x8d   : > { %p2925_p11 = pnand %p2345_p4, %p41_p2  ;;  %s262_s13 = scalar_lea.sflag [#allocation4], %s261_s16 }
  0x8e   : > { %s2554_s30 = scalar_lea.hbm %s2923_s11, 128  ;;  %s2559_s18 = scalar_lea.hbm %s3350_s0, 256 }
  0x8f   : > { %p2555_p12 = scmp.ne.s32.totalorder %s2923_s11, %s2554_s30  ;;  %p2556_p8 = pneg %p2925_p11 }
  0x90   : > { %p2560_p1 = scmp.lt.u32.totalorder %s2923_s11, %s3350_s0  ;;  %p2561_p3 = scmp.lt.u32.totalorder %s2559_s18, %s2554_s30 }
  0x91   : > { %p2557_p13 = pnand %p2556_p8, %p2555_p12  ;;  %p2563_p5 = scmp.lt.u32.totalorder %s2554_s30, %s2923_s11 }
  0x92   : > { %p2562_p2 = por %p2561_p3, %p2560_p1 }
  0x93   : > { %p2558_p0 = pneg %p2557_p13 }
  0x94   : > { %p2564_p9 = por %p2563_p5, %p2562_p2 }
  0x96   : > { %p2565_p4 = pnand %p2564_p9, %p2558_p0 }
  0x98   : > { %2568 = shalt.err (!%p2565_p4)
}
  0x99   : > { %s2569_s16 = scalar_lea.vmem %s2929_s15, 128  ;;  %s2673_s10 = smov [#allocation3]  }
  0x9a   : > { %p2570_p12 = scmp.ne.s32.totalorder %s2929_s15, %s2569_s16  ;;  %s2574_s17 = sshll.u32 %s2673_s10, 4  ;;  %s2575_s17 = int_to_ptr.vmem [resolvable:$false] %s2574_s17 }
  0x9b   : > { %s2576_s19 = scalar_lea.vmem %s2575_s17, 256  ;;  %p2577_p6 = scmp.lt.s32.totalorder %s2929_s15, %s2575_s17 }
  0x9c   : > { %p2572_p13 = pnand %p2570_p12, %p2556_p8  ;;  %p2578_p1 = scmp.lt.s32.totalorder %s2576_s19, %s2569_s16 }
  0x9e   : > { %p2573_p10 = pneg %p2572_p13  ;;  %p2579_p3 = por %p2578_p1, %p2577_p6 }
  0xa0   : > { %p2580_p2 = pnand %p2579_p3, %p2573_p10 }
  0xa2   : > { %2583 = shalt.err (!%p2580_p2)
}
  0xa3   : > { %2335 = dma.hbm_to_vmem [thread:$0]  (!%p2925_p11), %s2923_s11, 128, %s2929_s15, %s262_s13  }
  0xa4   : > { %p3368_p0 = scmp.ne.s32.totalorder %s3360_s28, 0 }
  0xa5   : > { %s2959_s30 = sand.u32 (!%p3368_p0), 1, %s2654_s22  }
  0xa6   : > { %282 = sbr.rel (%p3368_p0) target bundleno = 1341 (0x53d), region = 44  ;;  %s2170_s20 = sshll.u32 (!%p3368_p0), %s2959_s30, 3 }
  0xa7   : > { %s285_s18 = scalar_lea.sflag (!%p3368_p0), [#allocation4], %s2959_s30  ;;  %s2963_s29 = scalar_lea.vmem (!%p3368_p0), [#allocation3], %s2170_s20 }
  0xad   : > { %2629 = dma.done.wait (%p2905_p7), %s285_s18, 128  }
  0xae   : > { %2631 = vsyncadd (%p2905_p7), %s285_s18, 4294967168  ;;  %p3369_p6 = scmp.eq.s32.totalorder %s2746_s27, 0 }
  0xb0   : > { %2633 = dma.done.wait (%p3369_p6), [#allocation7], 1152   ;;  %p3370_p10 = pmov %p3369_p6 }
  0xb1   : > { %p3371_p11 = pmov %p3369_p6 }
  0xb2   : > { %2635 = vsyncadd (%p3370_p10), [#allocation7], 4294966144 }
  0xb3   : > { %2637 = dma.done.wait (%p3371_p11), [#allocation10], 192   ;;  %p3372_p8 = pmov %p3369_p6 }
  0xb4   : > { %p3373_p5 = pmov %p3369_p6 }
  0xb5   : > { %2639 = vsyncadd (%p3372_p8), [#allocation10], 4294967104 }
  0xb6   : > { %2641 = dma.done.wait (%p3373_p5), [#allocation13], 512   ;;  %p3374_p9 = pmov %p3373_p5 }
  0xb7   : > { %v352_v0 = vlaneseq  ;;  %v2674_v1 = vmov 0   ;;  %v2675_v3 = vmov 0.0   ;;  %v342_v6 = vld [vmem:[#allocation11] sm:$0xf]  ;;  %s2676_s28 = smov 112   ;;  %v2677_v11 = vmov 1  }
  0xb8   : > { %2643 = vsyncadd (%p3374_p9), [#allocation13], 4294966784  ;;  %2408 = vset.pattern.permute.xlu0 %v2674_v1  ;;  %488 = vmatprep.mubr.bf16.mxu0 %v2674_v1  ;;  %340 = vst [vmem:[#allocation2] sm:$0xff] %v2675_v3  ;;  %v406_v7 = vld [vmem:[#allocation12 + $0x1] ss:$8 sm:$0x3] }
  0xb9   : > { %v353_v2 = vshrl.u32 %v352_v0, 7  ;;  %341 = vst [vmem:[#allocation2 + $0x18] sm:$0xff] %v2675_v3  ;;  %1295 = vmatprep.mubr.bf16.mxu1 %v2674_v1  ;;  %347 = vperm.xlu0 %2408, %v342_v6   ;;  %v379_v10 = vld [vmem:[#allocation12] ss:$8 sm:$0x3]  ;;  %s2678_s7 = smov 111  }
  0xba   : > { %v560_v14 = vld [vmem:[#allocation12 + $0x2] ss:$8 sm:$0x3]  ;;  %v652_v17 = vld [vmem:[#allocation12 + $0x3] ss:$8 sm:$0x3] }
  0xbb   : > { %v2984_v4 = vsub.s32 0, %v353_v2  ;;  %v2986_v5 = vsub.s32 1, %v353_v2  ;;  %s2679_s11 = smov 113   ;;  %v803_v20 = vld [vmem:[#allocation12 + $0x5] ss:$8 sm:$0x3] }
  0xbc   : > { %s2680_s15 = smov 127   ;;  %s2681_s12 = smov 1   ;;  %v2682_v26 = vmov 839922192   ;;  %v3013_v33 = vld [vmem:[%s2963_s29] sm:$0xff]  ;;  %vm420_vm0 = vcmask 916480  }
  0xbd   : > { %v411_v8 = vrot.slane %v406_v7, %v2984_v4  ;;  %v415_v9 = vrot.slane %v406_v7, %v2986_v5  ;;  %2409 = vset.pattern.permute.xlu0 %v2677_v11  ;;  %v388_v12 = vrot.slane %v379_v10, %v2986_v5  ;;  %v384_v13 = vrot.slane %v379_v10, %v2984_v4  ;;  %s2683_s13 = smov 16   ;;  %v895_v45 = vld [vmem:[#allocation12 + $0x6] ss:$8 sm:$0x3]  ;;  %s2684_s8 = smov 15  }
  0xbe   : > { %359 = vperm.xlu0 %2409, %v342_v6   ;;  %v569_v15 = vrot.slane %v560_v14, %v2986_v5  ;;  %v565_v16 = vrot.slane %v560_v14, %v2984_v4  ;;  %v661_v18 = vrot.slane %v652_v17, %v2986_v5  ;;  %v657_v19 = vrot.slane %v652_v17, %v2984_v4  ;;  %v987_v58 = vld [vmem:[#allocation12 + $0x7] ss:$8 sm:$0x3]  ;;  %s2685_s16 = smov 17   ;;  %s2176_s10 = sshll.u32 %s2959_s30, 4 }
  0xbf   : > { %416 = vrot.lane.b32.xlu1 %v411_v8, %s2676_s28  ;;  %v812_v21 = vrot.slane %v803_v20, %v2986_v5  ;;  %v808_v22 = vrot.slane %v803_v20, %v2984_v4  ;;  %v3008_v23 = vld [vmem:[#allocation2] sm:$0xf]  ;;  %v350_v27 = vunpack.c.l.s4 %v2682_v26  ;;  %vm393_vm1 = vcmask 908288   ;;  %s2221_s17 = sshll.u32 %s2746_s27, 8  ;;  %s336_s19 = scalar_lea.vmem [#allocation14], %s2176_s10 }
  0xc0   : > { %v900_v52 = vrot.slane %v895_v45, %v2984_v4  ;;  %v904_v54 = vrot.slane %v895_v45, %v2986_v5  ;;  %vm574_vm2 = vcmask 924672   ;;  %v992_v0 = vrot.slane %v987_v58, %v2984_v4  ;;  %s2040_s20 = sshll.u32 %s336_s19, 4  ;;  %s2026_s27 = scalar_lea.sflag [#allocation5], %s2959_s30  ;;  %s3308_s20 = int_to_ptr.vmem [resolvable:$true] %s2040_s20 }
  0xc1   : > { %v351_v29 = vunpack.c.0.s8 %v350_v27  ;;  %v996_v3 = vrot.slane %v987_v58, %v2986_v5  ;;  %vm666_vm3 = vcmask 1039360   ;;  %vm688_vm4 = vcmask 7168   ;;  %p3375_p4 = scmp.ne.s32.totalorder %s3365_s25, 0 }
  0xc2   : > { %391 = vrot.lane.b32.xlu0 %v388_v12, %s2678_s7  ;;  %vm442_vm5 = vcmask 130048   ;;  %vm449_vm6 = vcmask 1041408   ;;  %vm596_vm7 = vcmask 121856   ;;  %vm445_vm8 = vcmask 31744  }
  0xc3   : > { %418 = vrot.lane.b32.xlu1 %v415_v9, %s2676_s28  ;;  %v354_v30 = vsub.s32 %v351_v29, %v353_v2  ;;  %v1079_v9 = vld [vmem:[#allocation12 + $0x10] ss:$8 sm:$0x3]  ;;  %vm506_vm9 = vcmask 138240   ;;  %vm1256_vm10 = vcmask 1043456   ;;  %vm1252_vm11 = vcmask 64512  }
  0xc4   : > { %v1088_v17 = vrot.slane %v1079_v9, %v2986_v5 }
  0xc6   : > { %572 = vrot.lane.b32.xlu0 %v569_v15, %s2679_s11  ;;  %v1084_v15 = vrot.slane %v1079_v9, %v2984_v4 }
  0xc7   : > { %389 = vrot.lane.b32.xlu1 %v384_v13, %s2678_s7 }
  0xca   : > { %664 = vrot.lane.b32.xlu0 %v661_v18, %s2680_s15 }
  0xcb   : > { %570 = vrot.lane.b32.xlu1 %v565_v16, %s2679_s11 }
  0xce   : > { %815 = vrot.lane.b32.xlu0 %v812_v21, %s2681_s12 }
  0xcf   : > { %662 = vrot.lane.b32.xlu1 %v657_v19, %s2680_s15 }
  0xd3   : > { %813 = vrot.lane.b32.xlu1 %v808_v22, %s2681_s12 }
 0x131   : > { %v417_v24 = vpop.permute.xlu1 %416 }
 0x132   : > { %v425_v25 = vmul.f32 %v417_v24, %v3008_v23 }
 0x134   : > { %v428_v28 = vpack.c.bf16 %v425_v25, %v425_v25  ;;  %v3059_v25 = vld [vmem:[#allocation2 + $0x18] sm:$0xf] }
 0x135   : > { %v419_v40 = vpop.permute.xlu1 %418 }
 0x136   : > { %436 = vrot.lane.b32.xlu1 %v428_v28, %s2683_s13  ;;  %v421_v42 = vsel %vm420_vm0, %v417_v24, %v419_v40 }
 0x138   : > { %v348_v31 = vpop.permute.xlu0 %347 }
 0x139   : > { %v355_v32 = vrot.slane %v348_v31, %v354_v30  ;;  %v390_v48 = vpop.permute.xlu1 %389 }
 0x13a   : > { %v398_v49 = vmul.f32 %v390_v48, %v3008_v23 }
 0x13b   : > { %v357_v35 = vmul.f32 %v355_v32, %v3013_v33 }
 0x13c   : > { %v401_v55 = vpack.c.bf16 %v398_v49, %v398_v49 }
 0x13d   : > { %v360_v34 = vpop.permute.xlu0 %359  ;;  %v571_v60 = vpop.permute.xlu1 %570 }
 0x13e   : > { %v367_v36 = vrot.slane %v360_v34, %v354_v30  ;;  %v579_v62 = vmul.f32 %v571_v60, %v3008_v23 }
 0x140   : > { %v369_v37 = vadd.f32 %v367_v36, %v357_v35  ;;  %v582_v6 = vpack.c.bf16 %v579_v62, %v579_v62 }
 0x141   : > { %v392_v50 = vpop.permute.xlu0 %391  ;;  %v663_v12 = vpop.permute.xlu1 %662 }
 0x142   : > { %v370_v38 = vmax.f32 %v369_v37, 0.0  ;;  %v394_v53 = vsel %vm393_vm1, %v390_v48, %v392_v50  ;;  %v671_v14 = vmul.f32 %v663_v12, %v3008_v23 }
 0x144   : > { %v372_v39 = vcombine.high %v370_v38, %v370_v38  ;;  %374 = vst [vmem:[#allocation2 + $0x8] sm:$0xf] %v370_v38  ;;  %v674_v18 = vpack.c.bf16 %v671_v14, %v671_v14 }
 0x145   : > { %v573_v63 = vpop.permute.xlu0 %572  ;;  %v814_v21 = vpop.permute.xlu1 %813 }
 0x146   : > { %375 = vst [vmem:[#allocation2 + $0x10] sm:$0xf] %v372_v39  ;;  %v575_v2 = vsel %vm574_vm2, %v571_v60, %v573_v63 }
 0x149   : > { %v665_v11 = vpop.permute.xlu0 %664 }
 0x14a   : > { %v667_v16 = vsel %vm666_vm3, %v663_v12, %v665_v11 }
 0x14b   : > { %v3016_v41 = vld [vmem:[#allocation2 + $0x8] sm:$0xf] }
 0x14c   : > { %v426_v43 = vmul.f32 %v421_v42, %v3016_v41  ;;  %v399_v56 = vmul.f32 %v394_v53, %v3016_v41  ;;  %v580_v7 = vmul.f32 %v575_v2, %v3016_v41  ;;  %v672_v19 = vmul.f32 %v667_v16, %v3016_v41  ;;  %v3053_v22 = vld [vmem:[#allocation2 + $0x8] sm:$0xf] }
 0x14d   : > { %v3020_v44 = vld [vmem:[#allocation2 + $0x10] sm:$0xf]  ;;  %v816_v20 = vpop.permute.xlu0 %815  ;;  %v822_v28 = vmul.f32 %v814_v21, %v3053_v22 }
 0x14e   : > { %v429_v46 = vpack.c.bf16 %v426_v43, %v426_v43  ;;  %v427_v47 = vmul.f32 %v419_v40, %v3020_v44  ;;  %v400_v57 = vmul.f32 %v392_v50, %v3020_v44  ;;  %v402_v59 = vpack.c.bf16 %v399_v56, %v399_v56  ;;  %v3057_v24 = vld [vmem:[#allocation2 + $0x10] sm:$0xf] }
 0x14f   : > { %v581_v8 = vmul.f32 %v573_v63, %v3020_v44  ;;  %v583_v10 = vpack.c.bf16 %v580_v7, %v580_v7  ;;  %v673_v23 = vmul.f32 %v665_v11, %v3020_v44  ;;  %v818_v26 = vsel %vm688_vm4, %v814_v21, %v816_v20 }
 0x150   : > { %438 = vrot.lane.b32.xlu0 %v429_v46, %s2683_s13  ;;  %v430_v51 = vpack.c.bf16 %v427_v47, %v427_v47  ;;  %v403_v61 = vpack.c.bf16 %v400_v57, %v400_v57  ;;  %v675_v27 = vpack.c.bf16 %v672_v19, %v672_v19  ;;  %v823_v30 = vmul.f32 %v818_v26, %v3057_v24  ;;  %v432_v46 = vld [vmem:[#allocation6 + $0x4] sm:$0xf] }
 0x151   : > { %v584_v13 = vpack.c.bf16 %v581_v8, %v581_v8  ;;  %v676_v29 = vpack.c.bf16 %v673_v23, %v673_v23  ;;  %v824_v31 = vmul.f32 %v816_v20, %v3059_v25  ;;  %v825_v32 = vpack.c.bf16 %v822_v28, %v822_v28 }
 0x152   : > { %440 = vrot.lane.b32.xlu1 %v430_v51, %s2683_s13  ;;  %v826_v34 = vpack.c.bf16 %v823_v30, %v823_v30  ;;  %v2686_v30 = vmov 2  }
 0x153   : > { %v827_v35 = vpack.c.bf16 %v824_v31, %v824_v31  ;;  %2410 = vset.pattern.permute.xlu1 %v2686_v30  ;;  %v2687_v31 = vmov 3  }
 0x154   : > { %905 = vrot.lane.b32.xlu0 %v900_v52, %s2684_s8 }
 0x155   : > { %2411 = vset.pattern.permute.xlu0 %v2687_v31 }
 0x156   : > { %907 = vrot.lane.b32.xlu1 %v904_v54, %s2684_s8 }
 0x158   : > { %500 = vrot.lane.b32.xlu0 %v401_v55, %s2685_s16 }
 0x15a   : > { %502 = vrot.lane.b32.xlu1 %v402_v59, %s2685_s16 }
 0x15c   : > { %504 = vrot.lane.b32.xlu0 %v403_v61, %s2685_s16 }
 0x15e   : > { %997 = vrot.lane.b32.xlu1 %v992_v0, %s2683_s13 }
 0x160   : > { %999 = vrot.lane.b32.xlu0 %v996_v3, %s2683_s13  ;;  %v404_v3 = vld [vmem:[#allocation6] sm:$0xf] }
 0x162   : > { %590 = vrot.lane.b32.xlu1 %v582_v6, %s2684_s8 }
 0x164   : > { %592 = vrot.lane.b32.xlu0 %v583_v10, %s2684_s8 }
 0x166   : > { %594 = vrot.lane.b32.xlu1 %v584_v13, %s2684_s8 }
 0x168   : > { %1089 = vrot.lane.b32.xlu0 %v1084_v15, %s2685_s16 }
 0x16a   : > { %1091 = vrot.lane.b32.xlu1 %v1088_v17, %s2685_s16 }
 0x16c   : > { %682 = vrot.lane.b32.xlu0 %v674_v18, %s2681_s12 }
 0x16e   : > { %684 = vrot.lane.b32.xlu1 %v675_v27, %s2681_s12  ;;  %v586_v27 = vld [vmem:[#allocation6 + $0x8] sm:$0xf] }
 0x170   : > { %686 = vrot.lane.b32.xlu0 %v676_v29, %s2681_s12 }
 0x172   : > { %833 = vrot.lane.b32.xlu1 %v825_v32, %s2680_s15  ;;  %v3112_v32 = vld [vmem:[#allocation11] sm:$0xff] }
 0x174   : > { %835 = vrot.lane.b32.xlu0 %v826_v34, %s2680_s15  ;;  %v1215_v34 = vld [vmem:[#allocation12 + $0x1] ss:$8 sm:$0x3] }
 0x176   : > { %837 = vrot.lane.b32.xlu1 %v827_v35, %s2680_s15 }
 0x1a8   : > { %v437_v36 = vpop.permute.xlu1 %436 }
 0x1c2   : > { %v439_v37 = vpop.permute.xlu0 %438 }
 0x1c3   : > { %v443_v38 = vsel %vm442_vm5, %v437_v36, %v439_v37  ;;  %v744_v36 = vpack.c.bf16 %v3020_v44, %v3020_v44  ;;  %v1224_v44 = vrot.slane %v1215_v34, %v2986_v5 }
 0x1c4   : > { %v441_v39 = vpop.permute.xlu1 %440  ;;  %v451_v43 = vsel %vm449_vm6, %v443_v38, 0 }
 0x1c5   : > { %v444_v40 = vsel %vm442_vm5, %v439_v37, %v441_v39  ;;  %v1190_v37 = vld [vmem:[#allocation12] ss:$8 sm:$0x3]  ;;  %v1220_v39 = vrot.slane %v1215_v34, %v2984_v4 }
 0x1c6   : > { %v906_v42 = vpop.permute.xlu0 %905  ;;  %2177 = vmatprep.subr.msk.bf16.mxu0 %vm449_vm6, %v444_v40  ;;  %v1195_v40 = vrot.slane %v1190_v37, %v2984_v4 }
 0x1c7   : > { %v914_v45 = vmul.f32 %v906_v42, %v3053_v22  ;;  %457 = vmatpush1.bf16.msra.mxu0 %v451_v43  ;;  %v743_v43 = vpack.c.bf16 %v3016_v41, %v3016_v41  ;;  %v1199_v41 = vrot.slane %v1190_v37, %v2986_v5 }
 0x1c8   : > { %v908_v47 = vpop.permute.xlu1 %907 }
 0x1c9   : > { %v917_v48 = vpack.c.bf16 %v914_v45, %v914_v45  ;;  %v910_v49 = vsel %vm596_vm7, %v906_v42, %v908_v47  ;;  %v916_v50 = vmul.f32 %v908_v47, %v3059_v25  ;;  %v1365_v42 = vld [vmem:[#allocation12 + $0x2] ss:$8 sm:$0x3]  ;;  %v678_v45 = vld [vmem:[#allocation6 + $0xc] sm:$0xf] }
 0x1ca   : > { %v915_v51 = vmul.f32 %v910_v49, %v3057_v24  ;;  %2178 = vmatmul.mubr.msk.bf16.vlgmr.msra.gmra.mrb[0].mxu0 %vm445_vm8, %v432_v46  ;;  %v501_v52 = vpop.permute.xlu0 %500  ;;  %v1370_v47 = vrot.slane %v1365_v42, %v2984_v4 }
 0x1cb   : > { %v919_v53 = vpack.c.bf16 %v916_v50, %v916_v50  ;;  %925 = vrot.lane.b32.xlu0 %v917_v48, %s2679_s11  ;;  %550 = vmatprep.mubr.bf16.mxu0 %v2674_v1  ;;  %v1454_v48 = vld [vmem:[#allocation12 + $0x3] ss:$8 sm:$0x3]  ;;  %v751_v50 = vsel %vm449_vm6, %v743_v43, 0 }
 0x1cc   : > { %v918_v54 = vpack.c.bf16 %v915_v51, %v915_v51  ;;  %v503_v55 = vpop.permute.xlu1 %502 }
 0x1cd   : > { %v507_v56 = vsel %vm506_vm9, %v501_v52, %v503_v55  ;;  %v1459_v52 = vrot.slane %v1454_v48, %v2984_v4 }
 0x1ce   : > { %927 = vrot.lane.b32.xlu1 %v918_v54, %s2679_s11  ;;  %v505_v57 = vpop.permute.xlu0 %504  ;;  %v513_v59 = vsel %vm449_vm6, %v507_v56, 0  ;;  %v1374_v54 = vrot.slane %v1365_v42, %v2986_v5  ;;  %v1463_v56 = vrot.slane %v1454_v48, %v2986_v5 }
 0x1cf   : > { %v508_v58 = vsel %vm506_vm9, %v503_v55, %v505_v57  ;;  %929 = vrot.lane.b32.xlu0 %v919_v53, %s2679_s11  ;;  %v1602_v53 = vld [vmem:[#allocation12 + $0x5] ss:$8 sm:$0x3] }
 0x1d0   : > { %v998_v60 = vpop.permute.xlu1 %997  ;;  %2179 = vmatprep.subr.msk.bf16.mxu0 %vm449_vm6, %v508_v58  ;;  %v1607_v55 = vrot.slane %v1602_v53, %v2984_v4  ;;  %v746_v58 = vld [vmem:[#allocation6 + $0x10] sm:$0xf] }
 0x1d1   : > { %v1006_v61 = vmul.f32 %v998_v60, %v3053_v22  ;;  %519 = vmatpush1.bf16.msra.mxu0 %v513_v59 }
 0x1d2   : > { %v1000_v62 = vpop.permute.xlu0 %999 }
 0x1d3   : > { %v1009_v63 = vpack.c.bf16 %v1006_v61, %v1006_v61  ;;  %v1002_v0 = vsel %vm442_vm5, %v998_v60, %v1000_v62  ;;  %v1008_v2 = vmul.f32 %v1000_v62, %v3059_v25  ;;  %v1611_v60 = vrot.slane %v1602_v53, %v2986_v5  ;;  %v829_v61 = vld [vmem:[#allocation6 + $0x14] sm:$0xf] }
 0x1d4   : > { %v1007_v6 = vmul.f32 %v1002_v0, %v3057_v24  ;;  %v591_v7 = vpop.permute.xlu1 %590 }
 0x1d5   : > { %v1011_v8 = vpack.c.bf16 %v1008_v2, %v1008_v2  ;;  %1017 = vrot.lane.b32.xlu1 %v1009_v63, %s2676_s28 }
 0x1d6   : > { %v1010_v9 = vpack.c.bf16 %v1007_v6, %v1007_v6  ;;  %2180 = vmatmul.mubr.msk.bf16.vlgmr.msra.gmra.mrb[0].mxu0 %vm445_vm8, %v404_v3  ;;  %v593_v10 = vpop.permute.xlu0 %592 }
 0x1d7   : > { %v597_v11 = vsel %vm596_vm7, %v591_v7, %v593_v10  ;;  %640 = vmatprep.mubr.bf16.mxu0 %v2674_v1  ;;  %v921_v7 = vld [vmem:[#allocation6 + $0x18] sm:$0xf] }
 0x1d8   : > { %v595_v12 = vpop.permute.xlu1 %594  ;;  %1019 = vrot.lane.b32.xlu0 %v1010_v9, %s2676_s28  ;;  %v603_v14 = vsel %vm449_vm6, %v597_v11, 0 }
 0x1d9   : > { %v598_v13 = vsel %vm596_vm7, %v593_v10, %v595_v12  ;;  %1021 = vrot.lane.b32.xlu1 %v1011_v8, %s2676_s28 }
 0x1da   : > { %2181 = vmatprep.subr.msk.bf16.mxu0 %vm449_vm6, %v598_v13  ;;  %v1090_v15 = vpop.permute.xlu0 %1089 }
 0x1db   : > { %v1098_v16 = vmul.f32 %v1090_v15, %v3053_v22  ;;  %609 = vmatpush1.bf16.msra.mxu0 %v603_v14  ;;  %v1013_v14 = vld [vmem:[#allocation6 + $0x1c] sm:$0xf] }
 0x1dc   : > { %v1092_v17 = vpop.permute.xlu1 %1091 }
 0x1dd   : > { %v1101_v18 = vpack.c.bf16 %v1098_v16, %v1098_v16  ;;  %v1094_v19 = vsel %vm506_vm9, %v1090_v15, %v1092_v17  ;;  %v1100_v20 = vmul.f32 %v1092_v17, %v3059_v25 }
 0x1de   : > { %v1099_v21 = vmul.f32 %v1094_v19, %v3057_v24  ;;  %v683_v23 = vpop.permute.xlu0 %682 }
 0x1df   : > { %v1103_v26 = vpack.c.bf16 %v1100_v20, %v1100_v20  ;;  %1109 = vrot.lane.b32.xlu0 %v1101_v18, %s2678_s7 }
 0x1e0   : > { %v1102_v28 = vpack.c.bf16 %v1099_v21, %v1099_v21  ;;  %v685_v29 = vpop.permute.xlu1 %684  ;;  %v1105_v21 = vld [vmem:[#allocation6 + $0x20] sm:$0xf] }
 0x1e1   : > { %v689_v22 = vsel %vm688_vm4, %v683_v23, %v685_v29 }
 0x1e2   : > { %2182 = vmatmul.mubr.msk.bf16.vlgmr.msra.gmra.mrb[0].mxu0 %vm445_vm8, %v586_v27  ;;  %1111 = vrot.lane.b32.xlu1 %v1102_v28, %s2678_s7  ;;  %v687_v25 = vpop.permute.xlu0 %686  ;;  %v695_v35 = vsel %vm449_vm6, %v689_v22, 0 }
 0x1e3   : > { %v690_v24 = vsel %vm688_vm4, %v685_v29, %v687_v25  ;;  %1113 = vrot.lane.b32.xlu0 %v1103_v26, %s2678_s7  ;;  %732 = vmatprep.mubr.bf16.mxu0 %v2674_v1 }
 0x1e4   : > { %2183 = vmatprep.subr.msk.bf16.mxu0 %vm449_vm6, %v690_v24  ;;  %v834_v38 = vpop.permute.xlu1 %833 }
 0x1e5   : > { %701 = vmatpush1.bf16.msra.mxu0 %v695_v35 }
 0x1e6   : > { %2185 = vmatprep.subr.msk.bf16.mxu0 %vm449_vm6, %v744_v36  ;;  %1172 = vperm.xlu1 %2410, %v3112_v32   ;;  %v836_v49 = vpop.permute.xlu0 %835 }
 0x1e7   : > { %1178 = vperm.xlu0 %2411, %v3112_v32   ;;  %v840_v57 = vsel %vm666_vm3, %v834_v38, %v836_v49 }
 0x1e8   : > { %v838_v46 = vpop.permute.xlu1 %837  ;;  %v846_v59 = vsel %vm449_vm6, %v840_v57, 0 }
 0x1e9   : > { %v841_v51 = vsel %vm666_vm3, %v836_v49, %v838_v46 }
 0x1ea   : > { %1225 = vrot.lane.b32.xlu1 %v1220_v39, %s2676_s28 }
 0x1eb   : > { %1200 = vrot.lane.b32.xlu0 %v1195_v40, %s2678_s7 }
 0x1ee   : > { %2184 = vmatmul.mubr.msk.bf16.vlgmr.msra.gmra.mrb[0].mxu0 %vm445_vm8, %v678_v45  ;;  %1227 = vrot.lane.b32.xlu1 %v1224_v44, %s2676_s28  ;;  %v1691_v44 = vld [vmem:[#allocation12 + $0x6] ss:$8 sm:$0x3] }
 0x1ef   : > { %757 = vmatpush1.bf16.msra.mxu0 %v751_v50  ;;  %788 = vmatprep.mubr.bf16.mxu0 %v2674_v1 }
 0x1f0   : > { %2187 = vmatprep.subr.msk.bf16.mxu0 %vm449_vm6, %v841_v51  ;;  %1375 = vrot.lane.b32.xlu0 %v1370_v47, %s2679_s11  ;;  %v1700_v51 = vrot.slane %v1691_v44, %v2986_v5 }
 0x1f2   : > { %1202 = vrot.lane.b32.xlu1 %v1199_v41, %s2678_s7  ;;  %v1696_v41 = vrot.slane %v1691_v44, %v2984_v4 }
 0x1f4   : > { %1464 = vrot.lane.b32.xlu0 %v1459_v52, %s2680_s15 }
 0x1f6   : > { %1377 = vrot.lane.b32.xlu1 %v1374_v54, %s2679_s11  ;;  %v1780_v54 = vld [vmem:[#allocation12 + $0x7] ss:$8 sm:$0x3] }
 0x1f8   : > { %1612 = vrot.lane.b32.xlu0 %v1607_v55, %s2681_s12 }
 0x1fa   : > { %2186 = vmatmul.mubr.msk.bf16.vlgmr.msra.gmra.mrb[0].mxu0 %vm445_vm8, %v746_v58  ;;  %1466 = vrot.lane.b32.xlu1 %v1463_v56, %s2680_s15 }
 0x1fb   : > { %852 = vmatpush1.bf16.msra.mxu0 %v846_v59  ;;  %883 = vmatprep.mubr.bf16.mxu0 %v2674_v1  ;;  %v1785_v59 = vrot.slane %v1780_v54, %v2984_v4 }
 0x1fe   : > { %1614 = vrot.lane.b32.xlu1 %v1611_v60, %s2681_s12 }
 0x206   : > { %2188 = vmatmul.mubr.msk.bf16.vlgmr.msra.gmra.mrb[0].mxu0 %vm445_vm8, %v829_v61 }
 0x207   : > { %975 = vmatprep.mubr.bf16.mxu0 %v2674_v1 }
 0x23d   : > { %v926_v62 = vpop.permute.xlu0 %925 }
 0x240   : > { %v928_v63 = vpop.permute.xlu1 %927 }
 0x241   : > { %v932_v0 = vsel %vm574_vm2, %v926_v62, %v928_v63  ;;  %v930_v2 = vpop.permute.xlu0 %929 }
 0x242   : > { %v938_v3 = vsel %vm449_vm6, %v932_v0, 0  ;;  %v933_v6 = vsel %vm574_vm2, %v928_v63, %v930_v2  ;;  %v1789_v0 = vrot.slane %v1780_v54, %v2986_v5 }
 0x243   : > { %2189 = vmatprep.subr.msk.bf16.mxu0 %vm449_vm6, %v933_v6 }
 0x244   : > { %944 = vmatpush1.bf16.msra.mxu0 %v938_v3 }
 0x247   : > { %v1018_v8 = vpop.permute.xlu1 %1017  ;;  %2190 = vmatmul.mubr.msk.bf16.vlgmr.msra.gmra.mrb[0].mxu0 %vm445_vm8, %v921_v7  ;;  %v1869_v7 = vld [vmem:[#allocation12 + $0x10] ss:$8 sm:$0x3] }
 0x248   : > { %1067 = vmatprep.mubr.bf16.mxu0 %v2674_v1 }
 0x24a   : > { %v1020_v9 = vpop.permute.xlu0 %1019 }
 0x24b   : > { %v1024_v10 = vsel %vm420_vm0, %v1018_v8, %v1020_v9  ;;  %v1022_v11 = vpop.permute.xlu1 %1021 }
 0x24c   : > { %v1030_v12 = vsel %vm449_vm6, %v1024_v10, 0  ;;  %v1025_v13 = vsel %vm420_vm0, %v1020_v9, %v1022_v11 }
 0x24d   : > { %2191 = vmatprep.subr.msk.bf16.mxu0 %vm449_vm6, %v1025_v13  ;;  %v1874_v13 = vrot.slane %v1869_v7, %v2984_v4 }
 0x24e   : > { %1036 = vmatpush1.bf16.msra.mxu0 %v1030_v12 }
 0x251   : > { %v1110_v15 = vpop.permute.xlu0 %1109 }
 0x253   : > { %2192 = vmatmul.mubr.msk.bf16.vlgmr.msra.gmra.mrb[0].mxu0 %vm445_vm8, %v1013_v14  ;;  %v1878_v14 = vrot.slane %v1869_v7, %v2986_v5 }
 0x254   : > { %v1112_v16 = vpop.permute.xlu1 %1111  ;;  %1159 = vmatprep.mubr.bf16.mxu0 %v2674_v1 }
 0x255   : > { %v1116_v17 = vsel %vm393_vm1, %v1110_v15, %v1112_v16  ;;  %v1114_v18 = vpop.permute.xlu0 %1113 }
 0x256   : > { %v1122_v19 = vsel %vm449_vm6, %v1116_v17, 0  ;;  %v1117_v20 = vsel %vm393_vm1, %v1112_v16, %v1114_v18 }
 0x257   : > { %2193 = vmatprep.subr.msk.bf16.mxu0 %vm449_vm6, %v1117_v20 }
 0x258   : > { %1128 = vmatpush1.bf16.msra.mxu0 %v1122_v19 }
 0x25f   : > { %2194 = vmatmul.mubr.msk.bf16.vlgmr.msra.gmra.mrb[0].mxu0 %vm445_vm8, %v1105_v21 }
 0x265   : > { %v1173_v23 = vpop.permute.xlu1 %1172 }
 0x266   : > { %v1179_v22 = vpop.permute.xlu0 %1178 }
 0x269   : > { %v1226_v26 = vpop.permute.xlu1 %1225 }
 0x26a   : > { %v1233_v27 = vmul.f32 0.0, %v1226_v26  ;;  %v1201_v46 = vpop.permute.xlu0 %1200 }
 0x26b   : > { %v1208_v50 = vmul.f32 0.0, %v1201_v46 }
 0x26c   : > { %v1236_v28 = vpack.c.bf16 %v1233_v27, %v1233_v27 }
 0x26d   : > { %v1228_v39 = vpop.permute.xlu1 %1227  ;;  %v1211_v53 = vpack.c.bf16 %v1208_v50, %v1208_v50 }
 0x26e   : > { %1244 = vrot.lane.b32.xlu0 %v1236_v28, %s2683_s13  ;;  %v1229_v40 = vsel %vm420_vm0, %v1226_v26, %v1228_v39  ;;  %v1376_v57 = vpop.permute.xlu0 %1375 }
 0x26f   : > { %v1383_v58 = vmul.f32 0.0, %v1376_v57 }
 0x271   : > { %v1203_v45 = vpop.permute.xlu1 %1202  ;;  %v1386_v63 = vpack.c.bf16 %v1383_v58, %v1383_v58 }
 0x272   : > { %v1204_v49 = vsel %vm393_vm1, %v1201_v46, %v1203_v45  ;;  %v1465_v6 = vpop.permute.xlu0 %1464 }
 0x273   : > { %v1472_v12 = vmul.f32 0.0, %v1465_v6 }
 0x275   : > { %v1378_v61 = vpop.permute.xlu1 %1377  ;;  %v1475_v17 = vpack.c.bf16 %v1472_v12, %v1472_v12 }
 0x276   : > { %v1379_v62 = vsel %vm574_vm2, %v1376_v57, %v1378_v61  ;;  %v1613_v16 = vpop.permute.xlu0 %1612 }
 0x279   : > { %v1467_v10 = vpop.permute.xlu1 %1466 }
 0x27a   : > { %v1468_v11 = vsel %vm666_vm3, %v1465_v6, %v1467_v10 }
 0x27d   : > { %v1615_v18 = vpop.permute.xlu1 %1614 }
 0x27e   : > { %v1622_v26 = vmul.f32 0.0, %v1615_v18 }
 0x280   : > { %v1625_v28 = vpack.c.bf16 %v1622_v26, %v1622_v26 }
 0x332   : > { %v1161_v29 = vpop.f32.mrb[0].mxu0 }
 0x333   : > { %v1175_v30 = vmul.f32 %v1173_v23, %v1161_v29  ;;  %v1163_v31 = vpop.f32.mrb[1].mxu0 }
 0x334   : > { %v1176_v25 = vmul.f32 %v1173_v23, %v1163_v31  ;;  %v1165_v24 = vpop.f32.mrb[2].mxu0  ;;  %v1616_v23 = vsel %vm688_vm4, %v1613_v16, %v1615_v18 }
 0x335   : > { %v1181_v34 = vadd.f32 %v1179_v22, %v1175_v30  ;;  %v1166_v35 = vpop.f32.mrb[3].mxu0  ;;  %v1245_v30 = vpop.permute.xlu0 %1244 }
 0x336   : > { %v1182_v36 = vadd.f32 %v1179_v22, %v1176_v25  ;;  %v1240_v35 = vld [vmem:[#allocation8 + $0x4] sm:$0xf] }
 0x337   : > { %v3172_v37 = vmax.f32 %v1181_v34, 0.0 }
 0x338   : > { %v3174_v38 = vmax.f32 %v1182_v36, 0.0 }
 0x339   : > { %1185 = vst [vmem:[#allocation2 + $0x8] sm:$0xff] %v3172_v37  ;;  %v1234_v42 = vmul.f32 %v1229_v40, %v3172_v37  ;;  %v1209_v52 = vmul.f32 %v1204_v49, %v3172_v37  ;;  %v1384_v3 = vmul.f32 %v1379_v62, %v3172_v37  ;;  %v1473_v15 = vmul.f32 %v1468_v11, %v3172_v37 }
 0x33a   : > { %1186 = vst [vmem:[#allocation2 + $0x10] sm:$0xff] %v3174_v38  ;;  %v1235_v43 = vmul.f32 %v1228_v39, %v3174_v38  ;;  %v1210_v55 = vmul.f32 %v1203_v45, %v3174_v38  ;;  %v1385_v2 = vmul.f32 %v1378_v61, %v3174_v38  ;;  %v1474_v19 = vmul.f32 %v1467_v10, %v3174_v38 }
 0x33b   : > { %v1237_v47 = vpack.c.bf16 %v1234_v42, %v1234_v42  ;;  %v1212_v56 = vpack.c.bf16 %v1209_v52, %v1209_v52  ;;  %v1387_v9 = vpack.c.bf16 %v1384_v3, %v1384_v3  ;;  %v1476_v20 = vpack.c.bf16 %v1473_v15, %v1473_v15  ;;  %v1390_v15 = vld [vmem:[#allocation8 + $0x8] sm:$0xf] }
 0x33c   : > { %v1238_v48 = vpack.c.bf16 %v1235_v43, %v1235_v43  ;;  %v1213_v60 = vpack.c.bf16 %v1210_v55, %v1210_v55  ;;  %v1388_v8 = vpack.c.bf16 %v1385_v2, %v1385_v2  ;;  %v1620_v21 = vmul.f32 %v1613_v16, %v3172_v37 }
 0x33d   : > { %1246 = vrot.lane.b32.xlu1 %v1237_v47, %s2683_s13  ;;  %v1477_v4 = vpack.c.bf16 %v1474_v19, %v1474_v19  ;;  %v1621_v5 = vmul.f32 %v1616_v23, %v3174_v38 }
 0x33e   : > { %1248 = vrot.lane.b32.xlu0 %v1238_v48, %s2683_s13  ;;  %v1623_v27 = vpack.c.bf16 %v1620_v21, %v1620_v21 }
 0x33f   : > { %v1624_v29 = vpack.c.bf16 %v1621_v5, %v1621_v5  ;;  %v1544_v5 = vpack.c.bf16 %v3174_v38, %v3174_v38 }
 0x341   : > { %1701 = vrot.lane.b32.xlu1 %v1696_v41, %s2684_s8 }
 0x342   : > { %1703 = vrot.lane.b32.xlu0 %v1700_v51, %s2684_s8 }
 0x345   : > { %1307 = vrot.lane.b32.xlu1 %v1211_v53, %s2685_s16 }
 0x346   : > { %1309 = vrot.lane.b32.xlu0 %v1212_v56, %s2685_s16  ;;  %v1214_v56 = vld [vmem:[#allocation8] sm:$0xf] }
 0x349   : > { %1311 = vrot.lane.b32.xlu1 %v1213_v60, %s2685_s16 }
 0x34a   : > { %1790 = vrot.lane.b32.xlu0 %v1785_v59, %s2683_s13 }
 0x34d   : > { %1792 = vrot.lane.b32.xlu1 %v1789_v0, %s2683_s13 }
 0x34e   : > { %1394 = vrot.lane.b32.xlu0 %v1386_v63, %s2684_s8 }
 0x351   : > { %1396 = vrot.lane.b32.xlu1 %v1387_v9, %s2684_s8 }
 0x352   : > { %1398 = vrot.lane.b32.xlu0 %v1388_v8, %s2684_s8 }
 0x355   : > { %1879 = vrot.lane.b32.xlu1 %v1874_v13, %s2685_s16 }
 0x356   : > { %1881 = vrot.lane.b32.xlu0 %v1878_v14, %s2685_s16 }
 0x359   : > { %1483 = vrot.lane.b32.xlu1 %v1475_v17, %s2681_s12 }
 0x35a   : > { %1485 = vrot.lane.b32.xlu0 %v1476_v20, %s2681_s12 }
 0x35d   : > { %1487 = vrot.lane.b32.xlu1 %v1477_v4, %s2681_s12 }
 0x35e   : > { %1631 = vrot.lane.b32.xlu0 %v1623_v27, %s2680_s15  ;;  %v1543_v27 = vpack.c.bf16 %v3172_v37, %v3172_v37 }
 0x361   : > { %1633 = vrot.lane.b32.xlu1 %v1624_v29, %s2680_s15 }
 0x362   : > { %1635 = vrot.lane.b32.xlu0 %v1625_v28, %s2680_s15  ;;  %v1479_v28 = vld [vmem:[#allocation8 + $0xc] sm:$0xf] }
 0x3af   : > { %v1247_v31 = vpop.permute.xlu1 %1246 }
 0x3b0   : > { %v1249_v22 = vpop.permute.xlu0 %1248  ;;  %v1250_v24 = vsel %vm442_vm5, %v1245_v30, %v1247_v31 }
 0x3b1   : > { %v1251_v25 = vsel %vm442_vm5, %v1247_v31, %v1249_v22  ;;  %v1258_v34 = vsel %vm1256_vm10, %v1250_v24, 0  ;;  %v1551_v31 = vsel %vm1256_vm10, %v1543_v27, 0  ;;  %v2688_v22 = vmov 4  }
 0x3b2   : > { %2195 = vmatprep.subr.msk.bf16.mxu1 %vm1256_vm10, %v1251_v25  ;;  %2412 = vset.pattern.permute.xlu0 %v2688_v22 }
 0x3b3   : > { %1264 = vmatpush1.bf16.msra.mxu1 %v1258_v34  ;;  %v1702_v36 = vpop.permute.xlu1 %1701  ;;  %v1627_v34 = vld [vmem:[#allocation8 + $0x14] sm:$0xf] }
 0x3b4   : > { %v1704_v39 = vpop.permute.xlu0 %1703  ;;  %v1709_v40 = vmul.f32 %v1702_v36, %v3172_v37 }
 0x3b5   : > { %v1705_v42 = vsel %vm596_vm7, %v1702_v36, %v1704_v39  ;;  %v1711_v43 = vmul.f32 0.0, %v1704_v39 }
 0x3b6   : > { %v1710_v44 = vmul.f32 %v1705_v42, %v3174_v38  ;;  %2196 = vmatmul.mubr.msk.bf16.vlgmr.msra.gmra.mrb[0].mxu1 %vm1252_vm11, %v1240_v35  ;;  %v1712_v45 = vpack.c.bf16 %v1709_v40, %v1709_v40 }
 0x3b7   : > { %1356 = vmatprep.mubr.bf16.mxu1 %v2674_v1  ;;  %v1308_v47 = vpop.permute.xlu1 %1307  ;;  %v1714_v49 = vpack.c.bf16 %v1711_v43, %v1711_v43  ;;  %v1716_v43 = vld [vmem:[#allocation8 + $0x18] sm:$0xf] }
 0x3b8   : > { %v1713_v46 = vpack.c.bf16 %v1710_v44, %v1710_v44  ;;  %v1310_v48 = vpop.permute.xlu0 %1309  ;;  %1720 = vrot.lane.b32.xlu1 %v1712_v45, %s2679_s11 }
 0x3b9   : > { %v1313_v50 = vsel %vm506_vm9, %v1308_v47, %v1310_v48 }
 0x3ba   : > { %1722 = vrot.lane.b32.xlu0 %v1713_v46, %s2679_s11  ;;  %v1319_v54 = vsel %vm1256_vm10, %v1313_v50, 0  ;;  %v1805_v50 = vld [vmem:[#allocation8 + $0x1c] sm:$0xf] }
 0x3bb   : > { %v1312_v41 = vpop.permute.xlu1 %1311 }
 0x3bc   : > { %v1791_v51 = vpop.permute.xlu0 %1790  ;;  %v1314_v52 = vsel %vm506_vm9, %v1310_v48, %v1312_v41  ;;  %1724 = vrot.lane.b32.xlu1 %v1714_v49, %s2679_s11  ;;  %s2689_s11 = smov [#allocation14]  }
 0x3bd   : > { %v1798_v53 = vmul.f32 %v1791_v51, %v3172_v37  ;;  %2197 = vmatprep.subr.msk.bf16.mxu1 %vm1256_vm10, %v1314_v52  ;;  %s2588_s15 = sshll.u32 %s2689_s11, 4  ;;  %s2589_s15 = int_to_ptr.vmem [resolvable:$false] %s2588_s15 }
 0x3be   : > { %1325 = vmatpush1.bf16.msra.mxu1 %v1319_v54  ;;  %s2590_s12 = scalar_lea.vmem %s2589_s15, 512  ;;  %p2591_p1 = scmp.lt.s32.totalorder %s3308_s20, %s2589_s15 }
 0x3bf   : > { %v1801_v55 = vpack.c.bf16 %v1798_v53, %v1798_v53  ;;  %v1793_v57 = vpop.permute.xlu1 %1792 }
 0x3c0   : > { %v1395_v58 = vpop.permute.xlu0 %1394  ;;  %v1794_v59 = vsel %vm442_vm5, %v1791_v51, %v1793_v57  ;;  %v1800_v60 = vmul.f32 0.0, %v1793_v57  ;;  %v1966_v51 = vcombine.high %v3013_v33, %v3013_v33 }
 0x3c1   : > { %1809 = vrot.lane.b32.xlu0 %v1801_v55, %s2676_s28  ;;  %v1799_v61 = vmul.f32 %v1794_v59, %v3174_v38  ;;  %v1894_v59 = vld [vmem:[#allocation8 + $0x20] sm:$0xf] }
 0x3c2   : > { %2198 = vmatmul.mubr.msk.bf16.vlgmr.msra.gmra.mrb[0].mxu1 %vm1252_vm11, %v1214_v56  ;;  %v1803_v62 = vpack.c.bf16 %v1800_v60, %v1800_v60  ;;  %v1969_v55 = vpack.c.bf16 %v1966_v51, %v1966_v51 }
 0x3c3   : > { %1443 = vmatprep.mubr.bf16.mxu1 %v2674_v1  ;;  %v1802_v63 = vpack.c.bf16 %v1799_v61, %v1799_v61  ;;  %v1397_v0 = vpop.permute.xlu1 %1396  ;;  %v1970_v61 = vld [vmem:[#allocation9] sm:$0xf] }
 0x3c4   : > { %v1399_v2 = vpop.permute.xlu0 %1398  ;;  %v1400_v3 = vsel %vm596_vm7, %v1395_v58, %v1397_v0  ;;  %v1968_v58 = vpack.c.bf16 %v3013_v33, %v3013_v33 }
 0x3c5   : > { %v1401_v6 = vsel %vm596_vm7, %v1397_v0, %v1399_v2  ;;  %1813 = vrot.lane.b32.xlu0 %v1803_v62, %s2676_s28  ;;  %v1406_v7 = vsel %vm1256_vm10, %v1400_v3, 0  ;;  %1811 = vrot.lane.b32.xlu1 %v1802_v63, %s2676_s28  ;;  %s3306_s28 = scalar_lea.hbm %s3356_s6, %s2221_s17 }
 0x3c6   : > { %2199 = vmatprep.subr.msk.bf16.mxu1 %vm1256_vm10, %v1401_v6  ;;  %v1975_v60 = vsel %vm449_vm6, %v1968_v58, 0 }
 0x3c7   : > { %1412 = vmatpush1.bf16.msra.mxu1 %v1406_v7  ;;  %v1880_v8 = vpop.permute.xlu1 %1879 }
 0x3c8   : > { %v1882_v9 = vpop.permute.xlu0 %1881  ;;  %v1887_v10 = vmul.f32 %v1880_v8, %v3172_v37 }
 0x3c9   : > { %v1883_v11 = vsel %vm506_vm9, %v1880_v8, %v1882_v9  ;;  %v1889_v12 = vmul.f32 0.0, %v1882_v9 }
 0x3ca   : > { %v1888_v13 = vmul.f32 %v1883_v11, %v3174_v38  ;;  %v1890_v14 = vpack.c.bf16 %v1887_v10, %v1887_v10  ;;  %v1546_v38 = vld [vmem:[#allocation8 + $0x10] sm:$0xf] }
 0x3cb   : > { %v1484_v17 = vpop.permute.xlu1 %1483  ;;  %v1892_v19 = vpack.c.bf16 %v1889_v12, %v1889_v12 }
 0x3cc   : > { %v1891_v16 = vpack.c.bf16 %v1888_v13, %v1888_v13  ;;  %v1486_v18 = vpop.permute.xlu0 %1485  ;;  %1898 = vrot.lane.b32.xlu1 %v1890_v14, %s2678_s7 }
 0x3cd   : > { %v1489_v20 = vsel %vm688_vm4, %v1484_v17, %v1486_v18 }
 0x3ce   : > { %2200 = vmatmul.mubr.msk.bf16.vlgmr.msra.gmra.mrb[0].mxu1 %vm1252_vm11, %v1390_v15  ;;  %1900 = vrot.lane.b32.xlu0 %v1891_v16, %s2678_s7  ;;  %v1495_v26 = vsel %vm1256_vm10, %v1489_v20, 0 }
 0x3cf   : > { %1532 = vmatprep.mubr.bf16.mxu1 %v2674_v1  ;;  %v1488_v21 = vpop.permute.xlu1 %1487 }
 0x3d0   : > { %v1490_v23 = vsel %vm688_vm4, %v1486_v18, %v1488_v21  ;;  %1902 = vrot.lane.b32.xlu1 %v1892_v19, %s2678_s7  ;;  %v1632_v4 = vpop.permute.xlu0 %1631  ;;  %s2584_s7 = scalar_lea.vmem %s3308_s20, 256 }
 0x3d1   : > { %2201 = vmatprep.subr.msk.bf16.mxu1 %vm1256_vm10, %v1490_v23  ;;  %p2585_p7 = scmp.ne.s32.totalorder %s3308_s20, %s2584_s7  ;;  %p2592_p3 = scmp.lt.s32.totalorder %s2590_s12, %s2584_s7 }
 0x3d2   : > { %1501 = vmatpush1.bf16.msra.mxu1 %v1495_v26  ;;  %1959 = vperm.xlu0 %2412, %v3112_v32  }
 0x3d3   : > { %2203 = vmatprep.subr.msk.bf16.mxu1 %vm1256_vm10, %v1544_v5  ;;  %v1634_v29 = vpop.permute.xlu1 %1633  ;;  %p2586_p12 = pnand %p2585_p7, %p3375_p4  ;;  %p2593_p2 = por %p2592_p3, %p2591_p1 }
 0x3d4   : > { %v1636_v30 = vpop.permute.xlu0 %1635  ;;  %v1637_v37 = vsel %vm666_vm3, %v1632_v4, %v1634_v29 }
 0x3d5   : > { %v1638_v25 = vsel %vm666_vm3, %v1634_v29, %v1636_v30  ;;  %v1643_v24 = vsel %vm1256_vm10, %v1637_v37, 0  ;;  %p2587_p13 = pneg %p2586_p12 }
 0x3d7   : > { %p2594_p0 = pnand %p2593_p2, %p2587_p13 }
 0x3da   : > { %2202 = vmatmul.mubr.msk.bf16.vlgmr.msra.gmra.mrb[0].mxu1 %vm1252_vm11, %v1479_v28 }
 0x3db   : > { %1557 = vmatpush1.bf16.msra.mxu1 %v1551_v31  ;;  %1588 = vmatprep.mubr.bf16.mxu1 %v2674_v1 }
 0x3dc   : > { %2205 = vmatprep.subr.msk.bf16.mxu1 %vm1256_vm10, %v1638_v25 }
 0x3e6   : > { %2204 = vmatmul.mubr.msk.bf16.vlgmr.msra.gmra.mrb[0].mxu1 %vm1252_vm11, %v1546_v38 }
 0x3e7   : > { %1649 = vmatpush1.bf16.msra.mxu1 %v1643_v24  ;;  %1680 = vmatprep.mubr.bf16.mxu1 %v2674_v1 }
 0x3f2   : > { %2206 = vmatmul.mubr.msk.bf16.vlgmr.msra.gmra.mrb[0].mxu1 %vm1252_vm11, %v1627_v34 }
 0x3f3   : > { %1769 = vmatprep.mubr.bf16.mxu1 %v2674_v1 }
 0x42a   : > { %v1721_v35 = vpop.permute.xlu1 %1720 }
 0x42c   : > { %v1723_v36 = vpop.permute.xlu0 %1722 }
 0x42d   : > { %v1726_v39 = vsel %vm574_vm2, %v1721_v35, %v1723_v36 }
 0x42e   : > { %v1725_v32 = vpop.permute.xlu1 %1724  ;;  %v1732_v42 = vsel %vm1256_vm10, %v1726_v39, 0 }
 0x42f   : > { %v1727_v40 = vsel %vm574_vm2, %v1723_v36, %v1725_v32 }
 0x430   : > { %2207 = vmatprep.subr.msk.bf16.mxu1 %vm1256_vm10, %v1727_v40 }
 0x431   : > { %1738 = vmatpush1.bf16.msra.mxu1 %v1732_v42 }
 0x433   : > { %v1810_v44 = vpop.permute.xlu0 %1809 }
 0x434   : > { %2208 = vmatmul.mubr.msk.bf16.vlgmr.msra.gmra.mrb[0].mxu1 %vm1252_vm11, %v1716_v43 }
 0x435   : > { %1858 = vmatprep.mubr.bf16.mxu1 %v2674_v1 }
 0x437   : > { %v1814_v45 = vpop.permute.xlu0 %1813  ;;  %v1812_v46 = vpop.permute.xlu1 %1811 }
 0x438   : > { %v1815_v47 = vsel %vm420_vm0, %v1810_v44, %v1812_v46  ;;  %v1816_v48 = vsel %vm420_vm0, %v1812_v46, %v1814_v45 }
 0x439   : > { %v1821_v49 = vsel %vm1256_vm10, %v1815_v47, 0  ;;  %2209 = vmatprep.subr.msk.bf16.mxu1 %vm1256_vm10, %v1816_v48 }
 0x43a   : > { %1827 = vmatpush1.bf16.msra.mxu1 %v1821_v49 }
 0x43e   : > { %v1899_v41 = vpop.permute.xlu1 %1898 }
 0x440   : > { %v1901_v52 = vpop.permute.xlu0 %1900  ;;  %2210 = vmatmul.mubr.msk.bf16.vlgmr.msra.gmra.mrb[0].mxu1 %vm1252_vm11, %v1805_v50 }
 0x441   : > { %v1904_v53 = vsel %vm393_vm1, %v1899_v41, %v1901_v52  ;;  %1947 = vmatprep.mubr.bf16.mxu1 %v2674_v1 }
 0x442   : > { %v1903_v54 = vpop.permute.xlu1 %1902  ;;  %v1910_v57 = vsel %vm1256_vm10, %v1904_v53, 0 }
 0x443   : > { %v1905_v56 = vsel %vm393_vm1, %v1901_v52, %v1903_v54 }
 0x444   : > { %2211 = vmatprep.subr.msk.bf16.mxu1 %vm1256_vm10, %v1905_v56 }
 0x445   : > { %1916 = vmatpush1.bf16.msra.mxu1 %v1910_v57 }
 0x446   : > { %2213 = vmatprep.subr.msk.bf16.mxu1 %vm449_vm6, %v1969_v55 }
 0x44c   : > { %2212 = vmatmul.mubr.msk.bf16.vlgmr.msra.gmra.mrb[0].mxu1 %vm1252_vm11, %v1894_v59 }
 0x44d   : > { %1981 = vmatpush1.bf16.msra.mxu1 %v1975_v60  ;;  %2012 = vmatprep.mubr.bf16.mxu1 %v2674_v1 }
 0x451   : > { %v1960_v62 = vpop.permute.xlu0 %1959 }
 0x458   : > { %2214 = vmatmul.mubr.msk.bf16.vlgmr.msra.gmra.mrb[0].mxu1 %vm445_vm8, %v1970_v61 }
 0x52b   : > { %v2014_v63 = vpop.f32.mrb[0].mxu1 }
 0x52c   : > { %v2222_v33 = vadd.f32 %v2014_v63, %v1960_v62  ;;  %v2016_v0 = vpop.f32.mrb[1].mxu1 }
 0x52d   : > { %v2223_v2 = vadd.f32 %v2016_v0, %v1960_v62  ;;  %v2018_v3 = vpop.f32.mrb[2].mxu1 }
 0x52e   : > { %2023 = vst [vmem:[%s336_s19] sm:$0xff] %v2222_v33  ;;  %v2019_v1 = vpop.f32.mrb[3].mxu1 }
 0x52f   : > { %2024 = vst [vmem:[%s336_s19 + $0x8] sm:$0xff] %v2223_v2 }
 0x530   : > { %2597 = shalt.err (!%p2594_p0)
}
 0x531   : > { %s2598_s30 = scalar_lea.hbm %s3306_s28, 256  ;;  %s2602_s16 = scalar_lea.hbm %s3356_s6, 512 }
 0x532   : > { %p2599_p6 = scmp.ne.s32.totalorder %s3306_s28, %s2598_s30  ;;  %p2603_p8 = scmp.lt.u32.totalorder %s3306_s28, %s3356_s6 }
 0x533   : > { %p2604_p5 = scmp.lt.u32.totalorder %s2602_s16, %s2598_s30  ;;  %p2606_p7 = scmp.lt.u32.totalorder %s2598_s30, %s3306_s28 }
 0x534   : > { %p2600_p10 = pnand %p2599_p6, %p3375_p4 }
 0x535   : > { %p2605_p9 = por %p2604_p5, %p2603_p8 }
 0x536   : > { %p2601_p11 = pneg %p2600_p10 }
 0x537   : > { %p2607_p12 = por %p2606_p7, %p2605_p9 }
 0x539   : > { %p2608_p13 = pnand %p2607_p12, %p2601_p11 }
 0x53b   : > { %2611 = shalt.err (!%p2608_p13)
}
 0x53c   : > { %2314 = dma.vmem_to_hbm [thread:$0]  (%p3375_p4), %s3308_s20, 256, %s3306_s28, %s2026_s27  }
 0x53d PF: > { %s2052_s19 = sand.u32 1, %s2650_s21   ;;  %p3376_p1 = scmp.ne.s32.totalorder %s3366_s26, 0 }
 0x53e   : > { %p3377_p3 = scmp.ge.s32.totalorder %s2662_s24, 2  ;;  %s2053_s18 = scalar_lea.sflag [#allocation5], %s2052_s19 }
 0x540   : > { %p2337_p2 = pnand %p3377_p3, %p3376_p1 }
 0x542   : > { %2645 = dma.done.wait (!%p2337_p2), %s2053_s18, 256  }
 0x543   : > { %2647 = vsyncadd (!%p2337_p2), %s2053_s18, 4294967040  ;;  %p22_p0 = scmp.ge.s32.totalorder %s2889_s9, 4   ;;  %s3378_s21 = smov %s2654_s22 }
 0x544   : > { %s3379_s22 = smov %s2658_s23  ;;  %s3380_s23 = smov %s2901_s14 }
 0x545   : > { %s3381_s24 = smov %s2889_s9  ;;  %24 = sbr.rel (!%p22_p0) target bundleno = 8 (0x8), region = 132 }
 0x54c   :  { %2058 = vsyncpa [#allocation4], 1 }
 0x54d   :  { %2060 = vsyncpa [#allocation4 + $0x1], 1 }
 0x54e   :  { %2061 = vsyncpa [#allocation7], 1 }
 0x54f   :  { %2062 = vsyncpa [#allocation10], 1 }
 0x550   :  { %2063 = vsyncpa [#allocation13], 1 }
 0x551   :  { %2064 = vsyncpa [#allocation5], 1 }
 0x552   :  { %2066 = vsyncpa [#allocation5 + $0x1], 1 }

</bundles_post_ra>
